<compile_context>
chip_gen: v5e
topology: v5e:2x2
jax: 0.10.0
libtpu: 0.0.40
codegen_flags: <defaults>
</compile_context>

<pallas_src>
import functools

import jax
import jax.numpy as jnp
import numpy as np
from jax.experimental import pallas as pl
from jax.experimental.pallas import tpu as pltpu

EPS = 1e-5
LANE = 128


# ----------------------------- Pallas kernel -------------------------------- #
def _fused_conv3x3_kernel(*refs, stride, th, wo, relu, mode):
    """One (batch, row-tile) step:
       out = [relu]( conv3x3(x)*scale_folded + bias  [+ residual | + xs@w_sc + b_sc] )
    """
    if mode == "project":
        x_ref, w_ref, b_ref, xs_ref, wsc_ref, bsc_ref, o_ref = refs
    elif mode == "identity":
        x_ref, w_ref, b_ref, res_ref, o_ref = refs
    else:  # "none"
        x_ref, w_ref, b_ref, o_ref = refs

    cin = x_ref.shape[-1]
    cout = o_ref.shape[-1]
    rows = (th - 1) * stride + 1                 # contiguous padded-input rows per tap
    row0 = pl.program_id(1) * (th * stride)      # top of this row-tile's window

    # 3x3 direct conv as 9 shifted matmuls, f32 accumulation (MXU, bf16 operands).
    acc = jnp.zeros((th * wo, cout), jnp.float32)
    for ki in range(3):                                       # statically unrolled
        win = x_ref[0, pl.ds(row0 + ki, rows), :, :]          # (rows, Wp, Cin) bf16
        for kj in range(3):
            if stride == 1:
                tap = win[:, kj:kj + wo, :]
            else:
                tap = win[::stride, kj:kj + (wo - 1) * stride + 1:stride, :]
            acc = acc + jnp.dot(tap.reshape(th * wo, cin), w_ref[ki, kj],
                                preferred_element_type=jnp.float32)

    y = acc + b_ref[...]                                      # folded-BN bias (f32)

    if mode == "project":
        # fused 1x1 projection shortcut (conv + folded BN) on the strided input
        xs = xs_ref[0].reshape(th * wo, xs_ref.shape[-1])
        y = y + jnp.dot(xs, wsc_ref[...], preferred_element_type=jnp.float32)
        y = y + bsc_ref[...]
    elif mode == "identity":
        y = y + res_ref[0].reshape(th * wo, cout).astype(jnp.float32)

    if relu:
        y = jnp.maximum(y, 0.0)
    o_ref[...] = y.reshape(1, th, wo, cout).astype(o_ref.dtype)


def fused_conv3x3(x_pad, w, bias, *, stride, ho, wo, th, relu, mode="none",
                  res=None, w_sc=None, b_sc=None, out_dtype=jnp.bfloat16):
    """Fused 3x3 conv + folded-BN (+shortcut, +ReLU).

    x_pad: (N, Hp, Wp, Ci) bf16 spatially padded NHWC activation.
    w:     (3, 3, Ci, Co)  bf16 weights with BN scale folded in.
    bias:  (1, Co) f32 folded-BN bias.
    mode:  "none" | "identity" (res = (N,Ho,Wo,Co) bf16)
                  | "project"  (res = strided input (N,Ho,Wo,Cix) bf16,
                                w_sc = (Cix,Co) bf16, b_sc = (1,Co) f32)
    """
    n, hp, wp, ci = x_pad.shape
    co = w.shape[-1]
    assert ho % th == 0
    r_tiles = ho // th

    in_specs = [
        pl.BlockSpec((1, hp, wp, ci), lambda b, r: (b, 0, 0, 0)),   # padded activation
        pl.BlockSpec((3, 3, ci, co), lambda b, r: (0, 0, 0, 0)),    # folded weights
        pl.BlockSpec((1, co), lambda b, r: (0, 0)),                 # folded bias
    ]
    args = [x_pad, w, bias]
    flops = 2 * n * ho * wo * 9 * ci * co
    if mode == "identity":
        in_specs.append(pl.BlockSpec((1, th, wo, co), lambda b, r: (b, r, 0, 0)))
        args.append(res)
    elif mode == "project":
        cix = res.shape[-1]
        in_specs += [
            pl.BlockSpec((1, th, wo, cix), lambda b, r: (b, r, 0, 0)),  # strided input
            pl.BlockSpec((cix, co), lambda b, r: (0, 0)),               # 1x1 weight
            pl.BlockSpec((1, co), lambda b, r: (0, 0)),                 # 1x1 bias
        ]
        args += [res, w_sc, b_sc]
        flops += 2 * n * ho * wo * cix * co

    out_spec = pl.BlockSpec((1, th, wo, co), lambda b, r: (b, r, 0, 0))
    out_shape = jax.ShapeDtypeStruct((n, ho, wo, co), out_dtype)

    bytes_accessed = sum(int(a.size) * a.dtype.itemsize for a in args)
    bytes_accessed += n * ho * wo * co * jnp.dtype(out_dtype).itemsize

    # VMEM budget estimate (double-buffered blocks + resident weights + f32 acc),
    # clamped so it is legal on v5e (16 MiB default scoped) and v7x (64 MiB physical).
    est = 2 * hp * wp * ci * 2                      # input block, 2 buffers, bf16
    est += 2 * 9 * ci * co * 2                      # resident 3x3 weights
    est += 2 * th * wo * co * jnp.dtype(out_dtype).itemsize
    est += th * wo * (ci + 2 * co) * 4              # taps + f32 accumulator
    if mode != "none":
        est += 2 * th * wo * res.shape[-1] * 2
        if mode == "project":
            est += 2 * res.shape[-1] * co * 2
    vmem_limit = int(min(max(3 * est, 32 << 20), 48 << 20))

    kernel = functools.partial(_fused_conv3x3_kernel, stride=stride, th=th,
                               wo=wo, relu=relu, mode=mode)
    return pl.pallas_call(
        kernel,
        out_shape=out_shape,
        grid=(n, r_tiles),
        in_specs=in_specs,
        out_specs=out_spec,
        compiler_params=pltpu.CompilerParams(
            dimension_semantics=("parallel", "parallel"),
            vmem_limit_bytes=vmem_limit),
        cost_estimate=pl.CostEstimate(flops=int(flops), transcendentals=0,
                                      bytes_accessed=int(bytes_accessed)),
    )(*args)


# ------------------------------ host-side prep ------------------------------ #
def _round_up(x, m):
    return ((x + m - 1) // m) * m


def _pad_channels(x, c_to):
    c = x.shape[-1]
    if c == c_to:
        return x
    return jnp.pad(x, ((0, 0),) * (x.ndim - 1) + ((0, c_to - c),))


def fold_bn(gamma, beta, mean, var):
    scale = gamma / jnp.sqrt(var + EPS)
    return scale, beta - mean * scale


def _prep_conv3x3_weight(w_oihw, scale, ci_p, co_p):
    """(Cout,Cin,3,3) -> (3,3,Cin_pad,Cout_pad) bf16 with BN scale folded in."""
    cout, cin = w_oihw.shape[:2]
    w = jnp.transpose(w_oihw, (2, 3, 1, 0)) * scale.reshape(1, 1, 1, cout)
    w = jnp.pad(w, ((0, 0), (0, 0), (0, ci_p - cin), (0, co_p - cout)))
    return w.astype(jnp.bfloat16)


def _prep_conv1x1_weight(w_oihw, scale, ci_p, co_p):
    cout, cin = w_oihw.shape[:2]
    w = w_oihw.reshape(cout, cin).T * scale.reshape(1, cout)
    w = jnp.pad(w, ((0, ci_p - cin), (0, co_p - cout)))
    return w.astype(jnp.bfloat16)


def _prep_bias(bias, co_p):
    return jnp.pad(bias, (0, co_p - bias.shape[0])).reshape(1, co_p).astype(jnp.float32)


def _pick_row_tile(n, ho, wo, max_tile_rows=1024, min_grid_steps=4):
    """Largest divisor of ho giving a few-hundred-row matmul tile while keeping
    enough grid steps for megacore sharding / pipelining."""
    divs = [d for d in range(1, ho + 1) if ho % d == 0]
    fit = [d for d in divs if d * wo <= max_tile_rows] or [1]
    good = [d for d in fit if (ho // d) * n >= min_grid_steps]
    return max(good) if good else max(fit)


def init_params(key, in_planes, planes, stride):
    keys = jax.random.split(key, 12)

    def bn(k1, k2, k3, k4, c):
        return dict(
            gamma=1.0 + 0.1 * jax.random.normal(k1, (c,), jnp.float32),
            beta=0.1 * jax.random.normal(k2, (c,), jnp.float32),
            mean=0.05 * jax.random.normal(k3, (c,), jnp.float32),
            var=1.0 + 0.1 * jnp.abs(jax.random.normal(k4, (c,), jnp.float32)),
        )

    params = dict(
        conv1_w=0.1 * jax.random.normal(keys[0], (planes, in_planes, 3, 3), jnp.float32),
        bn1=bn(keys[1], keys[2], keys[3], keys[4], planes),
        conv2_w=0.1 * jax.random.normal(keys[5], (planes, planes, 3, 3), jnp.float32),
        bn2=bn(keys[6], keys[7], keys[8], keys[9], planes),
    )
    if stride != 1 or in_planes != planes:
        params["sc_w"] = 0.1 * jax.random.normal(
            keys[10], (planes, in_planes, 1, 1), jnp.float32)
        kk = jax.random.split(keys[11], 4)
        params["sc_bn"] = bn(kk[0], kk[1], kk[2], kk[3], planes)
    return params


# ------------------------------ block forward ------------------------------- #
def basic_block_forward(x_nchw, params, stride):
    """BasicBlock forward (inference-mode BN).  Input/output: NCHW float32."""
    planes, in_planes = params["conv1_w"].shape[0], params["conv1_w"].shape[1]
    ci_p = _round_up(in_planes, LANE)
    co_p = _round_up(planes, LANE)

    x = jnp.transpose(x_nchw, (0, 2, 3, 1)).astype(jnp.bfloat16)   # NHWC bf16
    n, h, w, _ = x.shape
    xc = _pad_channels(x, ci_p)                                    # lane-dense channels
    ho = (h - 1) // stride + 1
    wo = (w - 1) // stride + 1
    th = _pick_row_tile(n, ho, wo)

    # ---- conv1 (3x3, stride) + bn1 + relu ----
    s1, b1 = fold_bn(**params["bn1"])
    w1 = _prep_conv3x3_weight(params["conv1_w"], s1, ci_p, co_p)
    x_sp = jnp.pad(xc, ((0, 0), (1, 1), (1, 1), (0, 0)))
    y1 = fused_conv3x3(x_sp, w1, _prep_bias(b1, co_p), stride=stride, ho=ho, wo=wo,
                       th=th, relu=True, mode="none", out_dtype=jnp.bfloat16)

    # ---- conv2 (3x3, stride 1) + bn2 + shortcut + relu (single fused kernel) ----
    s2, b2 = fold_bn(**params["bn2"])
    w2 = _prep_conv3x3_weight(params["conv2_w"], s2, co_p, co_p)
    y1_sp = jnp.pad(y1, ((0, 0), (1, 1), (1, 1), (0, 0)))

    if "sc_w" in params:
        ss, bs = fold_bn(**params["sc_bn"])
        w_sc = _prep_conv1x1_weight(params["sc_w"], ss, ci_p, co_p)
        xs = xc[:, ::stride, ::stride, :]        # strided 1x1-conv input, no blow-up
        out = fused_conv3x3(y1_sp, w2, _prep_bias(b2, co_p), stride=1, ho=ho, wo=wo,
                            th=th, relu=True, mode="project", res=xs,
                            w_sc=w_sc, b_sc=_prep_bias(bs, co_p),
                            out_dtype=jnp.float32)
    else:
        out = fused_conv3x3(y1_sp, w2, _prep_bias(b2, co_p), stride=1, ho=ho, wo=wo,
                            th=th, relu=True, mode="identity", res=xc,
                            out_dtype=jnp.float32)

    out = out[..., :planes]                       # drop channel padding
    return jnp.transpose(out, (0, 3, 1, 2))       # -> NCHW f32


# ------------------------------- references --------------------------------- #
def reference_forward_f32(x, params, stride):
    """Straight PyTorch-semantics reference, all f32."""
    def conv(x, w, s, p):
        return jax.lax.conv_general_dilated(
            x, w, (s, s), ((p, p), (p, p)),
            dimension_numbers=("NCHW", "OIHW", "NCHW"))

    def bn(x, b):
        sh = (1, -1, 1, 1)
        return (x - b["mean"].reshape(sh)) / jnp.sqrt(b["var"].reshape(sh) + EPS) \
            * b["gamma"].reshape(sh) + b["beta"].reshape(sh)

    y = jax.nn.relu(bn(conv(x, params["conv1_w"], stride, 1), params["bn1"]))
    y = bn(conv(y, params["conv2_w"], 1, 1), params["bn2"])
    sc = x
    if "sc_w" in params:
        sc = bn(conv(x, params["sc_w"], stride, 0), params["sc_bn"])
    return jax.nn.relu(y + sc)


def reference_forward_bf16(x, params, stride):
    """Mirrors the Pallas data path exactly: BN scale folded into weights,
    bf16 operands, f32 accumulation, bf16 inter-conv activation."""
    def conv(inp_bf16, w_oihw, scale, bias, s, p):
        wf = (w_oihw * scale[:, None, None, None]).astype(jnp.bfloat16)
        y = jax.lax.conv_general_dilated(
            inp_bf16, wf, (s, s), ((p, p), (p, p)),
            dimension_numbers=("NCHW", "OIHW", "NCHW"),
            preferred_element_type=jnp.float32)
        return y + bias.reshape(1, -1, 1, 1)

    xb = x.astype(jnp.bfloat16)
    s1, b1 = fold_bn(**params["bn1"])
    y1 = jax.nn.relu(conv(xb, params["conv1_w"], s1, b1, stride, 1)).astype(jnp.bfloat16)
    s2, b2 = fold_bn(**params["bn2"])
    y2 = conv(y1, params["conv2_w"], s2, b2, 1, 1)
    if "sc_w" in params:
        ss, bs = fold_bn(**params["sc_bn"])
        sc = conv(xb, params["sc_w"], ss, bs, stride, 0)
    else:
        sc = xb.astype(jnp.float32)
    return jax.nn.relu(y2 + sc)


# --------------------------------- main -------------------------------------- #
if __name__ == "__main__":
    key = jax.random.PRNGKey(0)
    k_x, k_p = jax.random.split(key)

    N, IN_PLANES, PLANES, H, W, STRIDE = 2, 4, 8, 16, 16, 1  # projection shortcut
    x = jax.random.normal(k_x, (N, IN_PLANES, H, W), jnp.float32)
    params = init_params(k_p, IN_PLANES, PLANES, STRIDE)

    out = jax.block_until_ready(basic_block_forward(x, params, STRIDE))

    # exact structural check against a reference mirroring the bf16/folded-BN path
    ref_mirror = jax.block_until_ready(reference_forward_bf16(x, params, STRIDE))
    np.testing.assert_allclose(np.asarray(out), np.asarray(ref_mirror),
                               rtol=1e-2, atol=1e-2)

    # loose semantic check against the full-f32 PyTorch-style reference
    ref_f32 = jax.block_until_ready(reference_forward_f32(x, params, STRIDE))
    np.testing.assert_allclose(np.asarray(out), np.asarray(ref_f32),
                               rtol=1e-1, atol=1e-1)

    print("KERNEL_OK")
</pallas_src>

<mosaic_0001>
module attributes {stable_mosaic.version = 11 : i64} {
  func.func @_fused_conv3x3_kernel(%arg0: i32, %arg1: i32, %arg2: memref<1x18x18x128xbf16, #tpu.memory_space<vmem>>, %arg3: memref<3x3x128x128xbf16, #tpu.memory_space<vmem>>, %arg4: memref<1x128xf32, #tpu.memory_space<vmem>>, %arg5: memref<1x8x16x128xbf16, #tpu.memory_space<vmem>>) attributes {dimension_semantics = [#tpu.dimension_semantics<parallel>, #tpu.dimension_semantics<parallel>], iteration_bounds = array<i64: 2, 2>, scalar_prefetch = 0 : i64, scratch_operands = 0 : i64, tpu.core_type = #tpu.core_type<tc>, window_params = [{transform_indices = @transform_0, window_bounds = array<i64: 1, 18, 18, 128>}, {pipeline_mode = #tpu.pipeline_mode<synchronous>, transform_indices = @transform_1, window_bounds = array<i64: 3, 3, 128, 128>}, {pipeline_mode = #tpu.pipeline_mode<synchronous>, transform_indices = @transform_2, window_bounds = array<i64: 1, 128>}, {transform_indices = @transform_3, window_bounds = array<i64: 1, 8, 16, 128>}]} {
    %c8_i32 = arith.constant 8 : i32
    %0 = arith.muli %arg1, %c8_i32 : i32
    %cst = arith.constant 0.000000e+00 : f32
    %1 = vector.broadcast %cst : f32 to vector<128x128xf32>
    %c0_i32 = arith.constant 0 : i32
    %2 = arith.addi %0, %c0_i32 : i32
    %c0 = arith.constant 0 : index
    %3 = arith.index_cast %2 : i32 to index
    %c0_0 = arith.constant 0 : index
    %c0_1 = arith.constant 0 : index
    %4 = vector.load %arg2[%c0, %3, %c0_0, %c0_1] : memref<1x18x18x128xbf16, #tpu.memory_space<vmem>>, vector<1x8x18x128xbf16>
    %5 = vector.shape_cast %4 : vector<1x8x18x128xbf16> to vector<8x18x128xbf16>
    %6 = vector.extract_strided_slice %5 {offsets = [0, 0, 0], sizes = [8, 16, 128], strides = [1, 1, 1]} : vector<8x18x128xbf16> to vector<8x16x128xbf16>
    %7 = vector.shape_cast %6 : vector<8x16x128xbf16> to vector<128x128xbf16>
    %c0_2 = arith.constant 0 : index
    %c0_3 = arith.constant 0 : index
    %c0_4 = arith.constant 0 : index
    %c0_5 = arith.constant 0 : index
    %8 = vector.load %arg3[%c0_2, %c0_3, %c0_4, %c0_5] : memref<3x3x128x128xbf16, #tpu.memory_space<vmem>>, vector<1x1x128x128xbf16>
    %9 = vector.shape_cast %8 : vector<1x1x128x128xbf16> to vector<128x128xbf16>
    %cst_6 = arith.constant dense<0.000000e+00> : vector<128x128xf32>
    %10 = tpu.matmul %7, %9, %cst_6 {dimension_numbers = #tpu.dot_dimension_numbers<[1], [0], [0], [1], [0, 0, 1, 1], [], []>} : vector<128x128xbf16>, vector<128x128xbf16>, vector<128x128xf32> -> vector<128x128xf32>
    %11 = arith.addf %1, %10 : vector<128x128xf32>
    %12 = vector.extract_strided_slice %5 {offsets = [0, 1, 0], sizes = [8, 16, 128], strides = [1, 1, 1]} : vector<8x18x128xbf16> to vector<8x16x128xbf16>
    %13 = vector.shape_cast %12 : vector<8x16x128xbf16> to vector<128x128xbf16>
    %c0_7 = arith.constant 0 : index
    %c1 = arith.constant 1 : index
    %c0_8 = arith.constant 0 : index
    %c0_9 = arith.constant 0 : index
    %14 = vector.load %arg3[%c0_7, %c1, %c0_8, %c0_9] : memref<3x3x128x128xbf16, #tpu.memory_space<vmem>>, vector<1x1x128x128xbf16>
    %15 = vector.shape_cast %14 : vector<1x1x128x128xbf16> to vector<128x128xbf16>
    %cst_10 = arith.constant dense<0.000000e+00> : vector<128x128xf32>
    %16 = tpu.matmul %13, %15, %cst_10 {dimension_numbers = #tpu.dot_dimension_numbers<[1], [0], [0], [1], [0, 0, 1, 1], [], []>} : vector<128x128xbf16>, vector<128x128xbf16>, vector<128x128xf32> -> vector<128x128xf32>
    %17 = arith.addf %11, %16 : vector<128x128xf32>
    %18 = vector.extract_strided_slice %5 {offsets = [0, 2, 0], sizes = [8, 16, 128], strides = [1, 1, 1]} : vector<8x18x128xbf16> to vector<8x16x128xbf16>
    %19 = vector.shape_cast %18 : vector<8x16x128xbf16> to vector<128x128xbf16>
    %c0_11 = arith.constant 0 : index
    %c2 = arith.constant 2 : index
    %c0_12 = arith.constant 0 : index
    %c0_13 = arith.constant 0 : index
    %20 = vector.load %arg3[%c0_11, %c2, %c0_12, %c0_13] : memref<3x3x128x128xbf16, #tpu.memory_space<vmem>>, vector<1x1x128x128xbf16>
    %21 = vector.shape_cast %20 : vector<1x1x128x128xbf16> to vector<128x128xbf16>
    %cst_14 = arith.constant dense<0.000000e+00> : vector<128x128xf32>
    %22 = tpu.matmul %19, %21, %cst_14 {dimension_numbers = #tpu.dot_dimension_numbers<[1], [0], [0], [1], [0, 0, 1, 1], [], []>} : vector<128x128xbf16>, vector<128x128xbf16>, vector<128x128xf32> -> vector<128x128xf32>
    %23 = arith.addf %17, %22 : vector<128x128xf32>
    %c1_i32 = arith.constant 1 : i32
    %24 = arith.addi %0, %c1_i32 : i32
    %c0_15 = arith.constant 0 : index
    %25 = arith.index_cast %24 : i32 to index
    %c0_16 = arith.constant 0 : index
    %c0_17 = arith.constant 0 : index
    %26 = vector.load %arg2[%c0_15, %25, %c0_16, %c0_17] : memref<1x18x18x128xbf16, #tpu.memory_space<vmem>>, vector<1x8x18x128xbf16>
    %27 = vector.shape_cast %26 : vector<1x8x18x128xbf16> to vector<8x18x128xbf16>
    %28 = vector.extract_strided_slice %27 {offsets = [0, 0, 0], sizes = [8, 16, 128], strides = [1, 1, 1]} : vector<8x18x128xbf16> to vector<8x16x128xbf16>
    %29 = vector.shape_cast %28 : vector<8x16x128xbf16> to vector<128x128xbf16>
    %c1_18 = arith.constant 1 : index
    %c0_19 = arith.constant 0 : index
    %c0_20 = arith.constant 0 : index
    %c0_21 = arith.constant 0 : index
    %30 = vector.load %arg3[%c1_18, %c0_19, %c0_20, %c0_21] : memref<3x3x128x128xbf16, #tpu.memory_space<vmem>>, vector<1x1x128x128xbf16>
    %31 = vector.shape_cast %30 : vector<1x1x128x128xbf16> to vector<128x128xbf16>
    %cst_22 = arith.constant dense<0.000000e+00> : vector<128x128xf32>
    %32 = tpu.matmul %29, %31, %cst_22 {dimension_numbers = #tpu.dot_dimension_numbers<[1], [0], [0], [1], [0, 0, 1, 1], [], []>} : vector<128x128xbf16>, vector<128x128xbf16>, vector<128x128xf32> -> vector<128x128xf32>
    %33 = arith.addf %23, %32 : vector<128x128xf32>
    %34 = vector.extract_strided_slice %27 {offsets = [0, 1, 0], sizes = [8, 16, 128], strides = [1, 1, 1]} : vector<8x18x128xbf16> to vector<8x16x128xbf16>
    %35 = vector.shape_cast %34 : vector<8x16x128xbf16> to vector<128x128xbf16>
    %c1_23 = arith.constant 1 : index
    %c1_24 = arith.constant 1 : index
    %c0_25 = arith.constant 0 : index
    %c0_26 = arith.constant 0 : index
    %36 = vector.load %arg3[%c1_23, %c1_24, %c0_25, %c0_26] : memref<3x3x128x128xbf16, #tpu.memory_space<vmem>>, vector<1x1x128x128xbf16>
    %37 = vector.shape_cast %36 : vector<1x1x128x128xbf16> to vector<128x128xbf16>
    %cst_27 = arith.constant dense<0.000000e+00> : vector<128x128xf32>
    %38 = tpu.matmul %35, %37, %cst_27 {dimension_numbers = #tpu.dot_dimension_numbers<[1], [0], [0], [1], [0, 0, 1, 1], [], []>} : vector<128x128xbf16>, vector<128x128xbf16>, vector<128x128xf32> -> vector<128x128xf32>
    %39 = arith.addf %33, %38 : vector<128x128xf32>
    %40 = vector.extract_strided_slice %27 {offsets = [0, 2, 0], sizes = [8, 16, 128], strides = [1, 1, 1]} : vector<8x18x128xbf16> to vector<8x16x128xbf16>
    %41 = vector.shape_cast %40 : vector<8x16x128xbf16> to vector<128x128xbf16>
    %c1_28 = arith.constant 1 : index
    %c2_29 = arith.constant 2 : index
    %c0_30 = arith.constant 0 : index
    %c0_31 = arith.constant 0 : index
    %42 = vector.load %arg3[%c1_28, %c2_29, %c0_30, %c0_31] : memref<3x3x128x128xbf16, #tpu.memory_space<vmem>>, vector<1x1x128x128xbf16>
    %43 = vector.shape_cast %42 : vector<1x1x128x128xbf16> to vector<128x128xbf16>
    %cst_32 = arith.constant dense<0.000000e+00> : vector<128x128xf32>
    %44 = tpu.matmul %41, %43, %cst_32 {dimension_numbers = #tpu.dot_dimension_numbers<[1], [0], [0], [1], [0, 0, 1, 1], [], []>} : vector<128x128xbf16>, vector<128x128xbf16>, vector<128x128xf32> -> vector<128x128xf32>
    %45 = arith.addf %39, %44 : vector<128x128xf32>
    %c2_i32 = arith.constant 2 : i32
    %46 = arith.addi %0, %c2_i32 : i32
    %c0_33 = arith.constant 0 : index
    %47 = arith.index_cast %46 : i32 to index
    %c0_34 = arith.constant 0 : index
    %c0_35 = arith.constant 0 : index
    %48 = vector.load %arg2[%c0_33, %47, %c0_34, %c0_35] : memref<1x18x18x128xbf16, #tpu.memory_space<vmem>>, vector<1x8x18x128xbf16>
    %49 = vector.shape_cast %48 : vector<1x8x18x128xbf16> to vector<8x18x128xbf16>
    %50 = vector.extract_strided_slice %49 {offsets = [0, 0, 0], sizes = [8, 16, 128], strides = [1, 1, 1]} : vector<8x18x128xbf16> to vector<8x16x128xbf16>
    %51 = vector.shape_cast %50 : vector<8x16x128xbf16> to vector<128x128xbf16>
    %c2_36 = arith.constant 2 : index
    %c0_37 = arith.constant 0 : index
    %c0_38 = arith.constant 0 : index
    %c0_39 = arith.constant 0 : index
    %52 = vector.load %arg3[%c2_36, %c0_37, %c0_38, %c0_39] : memref<3x3x128x128xbf16, #tpu.memory_space<vmem>>, vector<1x1x128x128xbf16>
    %53 = vector.shape_cast %52 : vector<1x1x128x128xbf16> to vector<128x128xbf16>
    %cst_40 = arith.constant dense<0.000000e+00> : vector<128x128xf32>
    %54 = tpu.matmul %51, %53, %cst_40 {dimension_numbers = #tpu.dot_dimension_numbers<[1], [0], [0], [1], [0, 0, 1, 1], [], []>} : vector<128x128xbf16>, vector<128x128xbf16>, vector<128x128xf32> -> vector<128x128xf32>
    %55 = arith.addf %45, %54 : vector<128x128xf32>
    %56 = vector.extract_strided_slice %49 {offsets = [0, 1, 0], sizes = [8, 16, 128], strides = [1, 1, 1]} : vector<8x18x128xbf16> to vector<8x16x128xbf16>
    %57 = vector.shape_cast %56 : vector<8x16x128xbf16> to vector<128x128xbf16>
    %c2_41 = arith.constant 2 : index
    %c1_42 = arith.constant 1 : index
    %c0_43 = arith.constant 0 : index
    %c0_44 = arith.constant 0 : index
    %58 = vector.load %arg3[%c2_41, %c1_42, %c0_43, %c0_44] : memref<3x3x128x128xbf16, #tpu.memory_space<vmem>>, vector<1x1x128x128xbf16>
    %59 = vector.shape_cast %58 : vector<1x1x128x128xbf16> to vector<128x128xbf16>
    %cst_45 = arith.constant dense<0.000000e+00> : vector<128x128xf32>
    %60 = tpu.matmul %57, %59, %cst_45 {dimension_numbers = #tpu.dot_dimension_numbers<[1], [0], [0], [1], [0, 0, 1, 1], [], []>} : vector<128x128xbf16>, vector<128x128xbf16>, vector<128x128xf32> -> vector<128x128xf32>
    %61 = arith.addf %55, %60 : vector<128x128xf32>
    %62 = vector.extract_strided_slice %49 {offsets = [0, 2, 0], sizes = [8, 16, 128], strides = [1, 1, 1]} : vector<8x18x128xbf16> to vector<8x16x128xbf16>
    %63 = vector.shape_cast %62 : vector<8x16x128xbf16> to vector<128x128xbf16>
    %c2_46 = arith.constant 2 : index
    %c2_47 = arith.constant 2 : index
    %c0_48 = arith.constant 0 : index
    %c0_49 = arith.constant 0 : index
    %64 = vector.load %arg3[%c2_46, %c2_47, %c0_48, %c0_49] : memref<3x3x128x128xbf16, #tpu.memory_space<vmem>>, vector<1x1x128x128xbf16>
    %65 = vector.shape_cast %64 : vector<1x1x128x128xbf16> to vector<128x128xbf16>
    %cst_50 = arith.constant dense<0.000000e+00> : vector<128x128xf32>
    %66 = tpu.matmul %63, %65, %cst_50 {dimension_numbers = #tpu.dot_dimension_numbers<[1], [0], [0], [1], [0, 0, 1, 1], [], []>} : vector<128x128xbf16>, vector<128x128xbf16>, vector<128x128xf32> -> vector<128x128xf32>
    %67 = arith.addf %61, %66 : vector<128x128xf32>
    %c0_51 = arith.constant 0 : index
    %c0_52 = arith.constant 0 : index
    %68 = vector.load %arg4[%c0_51, %c0_52] : memref<1x128xf32, #tpu.memory_space<vmem>>, vector<1x128xf32>
    %69 = vector.broadcast %68 : vector<1x128xf32> to vector<128x128xf32>
    %70 = arith.addf %67, %69 : vector<128x128xf32>
    %cst_53 = arith.constant 0.000000e+00 : f32
    %71 = vector.broadcast %cst_53 : f32 to vector<128x128xf32>
    %72 = arith.maximumf %70, %71 : vector<128x128xf32>
    %73 = vector.shape_cast %72 : vector<128x128xf32> to vector<1x8x16x128xf32>
    %74 = arith.truncf %73 : vector<1x8x16x128xf32> to vector<1x8x16x128xbf16>
    %c0_54 = arith.constant 0 : index
    %c0_55 = arith.constant 0 : index
    %c0_56 = arith.constant 0 : index
    %c0_57 = arith.constant 0 : index
    %75 = vector.load %arg5[%c0_54, %c0_55, %c0_56, %c0_57] : memref<1x8x16x128xbf16, #tpu.memory_space<vmem>>, vector<1x8x16x128xbf16>
    tpu.vector_store %arg5[%c0_54, %c0_55, %c0_56, %c0_57], %74 {strides = array<i32>} : memref<1x8x16x128xbf16, #tpu.memory_space<vmem>>, vector<1x8x16x128xbf16>,
    return
  }
  func.func @transform_0(%arg0: i32, %arg1: i32) -> (i32, i32, i32, i32) {
    %c0_i32 = arith.constant 0 : i32
    %c0_i32_0 = arith.constant 0 : i32
    %c0_i32_1 = arith.constant 0 : i32
    %c0_i32_2 = arith.constant 0 : i32
    return %arg0, %c0_i32, %c0_i32_0, %c0_i32_1 : i32, i32, i32, i32
  }
  func.func @transform_1(%arg0: i32, %arg1: i32) -> (i32, i32, i32, i32) {
    %c0_i32 = arith.constant 0 : i32
    %c0_i32_0 = arith.constant 0 : i32
    %c0_i32_1 = arith.constant 0 : i32
    %c0_i32_2 = arith.constant 0 : i32
    %c0_i32_3 = arith.constant 0 : i32
    return %c0_i32, %c0_i32_0, %c0_i32_1, %c0_i32_2 : i32, i32, i32, i32
  }
  func.func @transform_2(%arg0: i32, %arg1: i32) -> (i32, i32) {
    %c0_i32 = arith.constant 0 : i32
    %c0_i32_0 = arith.constant 0 : i32
    %c0_i32_1 = arith.constant 0 : i32
    return %c0_i32, %c0_i32_0 : i32, i32
  }
  func.func @transform_3(%arg0: i32, %arg1: i32) -> (i32, i32, i32, i32) {
    %c0_i32 = arith.constant 0 : i32
    %c0_i32_0 = arith.constant 0 : i32
    %c0_i32_1 = arith.constant 0 : i32
    return %arg0, %arg1, %c0_i32, %c0_i32_0 : i32, i32, i32, i32
  }
}

</mosaic_0001>

<bundles_post_ra>
// kernel: tpu_custom_call.1
= control target key start
LH: loop header
LB: loop body
LE: loop exit
PB: predicated region body
PF: predicated region fallthrough
CT: control target
= control target key end

     0   :  { %8 = vsyncpa [#allocation3], 0  ;;  %s4764_s0 = inlined_call_operand.vmem [shape: bf16[2,18,18,128], index: 0, kind: input, shape index: {}]   ;;  %s4765_s1 = inlined_call_operand.vmem [shape: bf16[3,3,128,128], index: 1, kind: input, shape index: {}]   ;;  %s4766_s2 = inlined_call_operand.vmem [shape: f32[1,128], index: 2, kind: input, shape index: {}]   ;;  %s4767_s3 = inlined_call_operand.hbm [shape: bf16[2,16,16,128], index: 3, kind: output, shape index: {}]  }
   0x1   :  { %10 = vsyncpa [#allocation3 + $0x1], 0  ;;  %s3658_s12 = smov 0   ;;  %s3660_s13 = smov 0  }
   0x2   :  { %s3662_s14 = smov 0   ;;  %s3664_s15 = smov 0  }
   0x3   :  { %s3666_s16 = smov 0   ;;  %s3668_s17 = smov 0  }
   0x4   :  { %s3670_s18 = smov 0   ;;  %s3672_s19 = smov 0  }
   0x5 LB: > { %s2688_s20 = sadd.s32 4294967295, %s3634_s19   ;;  %s2689_s21 = sadd.s32 4294967294, %s3634_s19   ;;  %s3634_s19 = sphi %s3672_s19, %s16_s19   ;;  %s3630_s18 = sphi %s3670_s18, %s4791_s18   ;;  %s3626_s17 = sphi %s3668_s17, %s4790_s17   ;;  %s3622_s16 = sphi %s3666_s16, %s4789_s16   ;;  %s3618_s15 = sphi %s3664_s15, %s4788_s15   ;;  %s3614_s14 = sphi %s3662_s14, %s4787_s14   ;;  %s3610_s13 = sphi %s3660_s13, %s4786_s13   ;;  %s3606_s12 = sphi %s3658_s12, %s4785_s12  }
   0x6   : > { %s25_s22 = sadd.s32 1, %s3626_s17  ;;  %s28_s23 = sadd.s32 1, %s3630_s18 }
   0x7   : > { %p26_p0 = scmp.ge.s32.totalorder %s25_s22, 2  ;;  %p115_p1 = scmp.ne.s32.totalorder %s3614_s14, %s3610_s13 }
   0x8   : > { %p116_p2 = scmp.eq.s32.totalorder %s2688_s20, 3  ;;  %p121_p5 = scmp.ne.s32.totalorder %s3610_s13, %s3606_s12 }
   0x9   : > { %s4793_s22 = smov (%p26_p0, %s25_s22), 0  ;;  %s4795_s23 = smov (!%p26_p0, %s28_s23), %s3630_s18 }
   0xa   : > { %s101_s24 = ssub.s32 %s3626_s17, %s4793_s22  ;;  %p3709_p3 = por %p116_p2, %p115_p1 }
   0xb   : > { %p30_p4 = scmp.ge.s32.totalorder %s4795_s23, 2  ;;  %p122_p6 = scmp.eq.s32.totalorder %s2689_s21, 3 }
   0xc   : > { %p2692_p7 = scmp.ge.s32.totalorder %s3634_s19, 1  ;;  %p154_p9 = scmp.lt.s32.totalorder %s3634_s19, 5 }
   0xd   : > { %s4797_s23 = smov (%p30_p4, %s4795_s23), 0  ;;  %p3718_p8 = por %p122_p6, %p121_p5 }
   0xe   : > { %s100_s27 = ssub.s32 %s3630_s18, %s4797_s23  ;;  %s105_s28 = sadd.s32 1, %s3614_s14 }
   0xf   : > { %s102_s29 = sor.u32 %s101_s24, %s100_s27  ;;  %p155_p10 = pnand %p2692_p7, %p154_p9 }
  0x10   : > { %p103_p11 = scmp.eq.s32.totalorder %s102_s29, 0 }
  0x11   : > { %158 = sbr.rel (%p155_p10) target bundleno = 482 (0x1e2), region = 32 }
  0x12   : > { %s3727_s30 = scalar_select %p103_p11, %s3614_s14, %s105_s28  }
  0x16   : > { %v3317_v0 = vld [vmem:[%s4765_s1 + $0x78] sm:$0xff]  ;;  %p178_p12 = scmp.lt.s32.totalorder %s3622_s16, 1  ;;  %v3316_v1 = vld [vmem:[%s4765_s1 + $0x70] sm:$0xff]  ;;  %s3293_s9 = smul.u32 96, %s3618_s15  ;;  %v3315_v2 = vld [vmem:[%s4765_s1 + $0x68] sm:$0xff]  ;;  %vm722_vm3 = vcmask 1042432  }
  0x17   : > { %3438 = vmatpush.bf16.msra.mxu1 %v3317_v0  ;;  %3439 = vmatpush.bf16.msra.mxu2 %v3317_v0  ;;  %vm228_vm0 = vsmask.f32 3328  ;;  %vm229_vm1 = vsmask.f32 7440  ;;  %v3314_v3 = vld [vmem:[%s4765_s1 + $0x60] sm:$0xff]  ;;  %v3313_v30 = vld [vmem:[%s4765_s1 + $0x58] sm:$0xff] }
  0x18   : > { %s179_s8 = scalar_select %p178_p12, %s3622_s16, 1  ;;  %3440 = vmatpush.bf16.msra.mxu3 %v3317_v0  ;;  %520 = vmatpush.bf16.msra.mxu0 %v3317_v0  ;;  %vm3784_vm2 = vmor %vm228_vm0, %vm229_vm1  ;;  %v3312_v50 = vld [vmem:[%s4765_s1 + $0x50] sm:$0xff]  ;;  %vm723_vm4 = vcmask 1046532  }
  0x19   : > { %vm4013_vm5 = vmor %vm722_vm3, %vm723_vm4  ;;  %s175_s20 = sand.u32 1, %s3610_s13   ;;  %s3289_s29 = sshll.u32 %s3622_s16, 5 }
  0x1a   : > { %s3462_s10 = smul.u32 216, %s179_s8  ;;  %s2693_s21 = sshll.u32 %s175_s20, 6 }
  0x1b   : > { %3441 = vmatpush.bf16.msra.mxu1 %v3316_v1  ;;  %3442 = vmatpush.bf16.msra.mxu2 %v3316_v1  ;;  %s4681_s24 = scalar_lea.vmem [#allocation2], %s2693_s21 }
  0x1c   : > { %s182_s27 = scalar_lea.vmem %s4764_s0, %s3462_s10  ;;  %3443 = vmatpush.bf16.msra.mxu3 %v3316_v1  ;;  %521 = vmatpush.bf16.msra.mxu0 %v3316_v1  ;;  %s2599_s7 = sshll.u32 %s4681_s24, 4  ;;  %s2600_s7 = int_to_ptr.vmem [resolvable:$true] %s2599_s7 }
  0x1d   : > { %s3744_s28 = scalar_lea.vmem %s182_s27, %s3293_s9  ;;  %s3390_s27 = sshll.u32 %s3618_s15, 4 }
  0x1e   : > { %v3750_v4 = vld [vmem:[%s3744_s28 + $0x18] sm:$0xf]  ;;  %v3753_v5 = vld [vmem:[%s3744_s28 + $0x1c] sm:$0xf]  ;;  %v3756_v6 = vld [vmem:[%s3744_s28 + $0x20] sm:$0x1]  ;;  %s2596_s4 = sadd.s32 %s3390_s27, %s3289_s29 }
  0x1f   : > { %v280_v7 = vshrl.u32 %v3750_v4, 16  ;;  %v283_v8 = vshll.u32 %v3750_v4, 16  ;;  %v289_v9 = vshll.u32 %v3753_v5, 16  ;;  %v293_v10 = vshrl.u32 %v3753_v5, 16  ;;  %v3763_v11 = vld [vmem:[%s3744_s28 + $0x30] sm:$0xf]  ;;  %3444 = vmatpush.bf16.msra.mxu1 %v3315_v2  ;;  %3445 = vmatpush.bf16.msra.mxu2 %v3315_v2 }
  0x20   : > { %v299_v12 = vshll.u32 %v3756_v6, 16  ;;  %v3767_v13 = vld [vmem:[%s3744_s28 + $0x34] sm:$0xf]  ;;  %v3770_v14 = vld [vmem:[%s3744_s28 + $0x38] sm:$0x1]  ;;  %v328_v15 = vshrl.u32 %v3763_v11, 16  ;;  %3446 = vmatpush.bf16.msra.mxu3 %v3315_v2  ;;  %522 = vmatpush.bf16.msra.mxu0 %v3315_v2 }
  0x21   : > { %v282_v16 = vrot.slane %v280_v7, 4  ;;  %v285_v17 = vrot.slane %v283_v8, 5  ;;  %v291_v18 = vrot.slane %v289_v9, 5  ;;  %v295_v19 = vrot.slane %v293_v10, 4  ;;  %v206_v20 = vld [vmem:[%s3744_s28 + $0x48] sm:$0xf] }
  0x22   : > { %v301_v21 = vrot.slane %v299_v12, 5  ;;  %v330_v22 = vrot.slane %v328_v15, 4  ;;  %v331_v23 = vshll.u32 %v3763_v11, 16  ;;  %v337_v24 = vshll.u32 %v3767_v13, 16  ;;  %v207_v29 = vld [vmem:[%s3744_s28 + $0x4c] sm:$0xf] }
  0x23   : > { %v286_v25 = vor.u32 %v285_v17, %v282_v16  ;;  %v296_v26 = vor.u32 %v295_v19, %v291_v18  ;;  %v341_v27 = vshrl.u32 %v3767_v13, 16  ;;  %v347_v28 = vshll.u32 %v3770_v14, 16  ;;  %3447 = vmatpush.bf16.msra.mxu1 %v3314_v3  ;;  %3448 = vmatpush.bf16.msra.mxu2 %v3314_v3  ;;  %v208_v41 = vld [vmem:[%s3744_s28 + $0x50] sm:$0x1]  ;;  %v3794_v49 = vld [vmem:[%s3744_s28] sm:$0xf] }
  0x24   : > { %v333_v32 = vrot.slane %v331_v23, 5  ;;  %v339_v33 = vrot.slane %v337_v24, 5  ;;  %v376_v34 = vshrl.u32 %v206_v20, 16  ;;  %v379_v35 = vshll.u32 %v206_v20, 16  ;;  %3449 = vmatpush.bf16.msra.mxu3 %v3314_v3  ;;  %523 = vmatpush.bf16.msra.mxu0 %v3314_v3  ;;  %v3808_v62 = vld [vmem:[%s3744_s28 + $0x4] sm:$0xf] }
  0x25   : > { %v287_v36 = vrot.slane %v286_v25, 4  ;;  %v297_v37 = vrot.slane %v296_v26, 4  ;;  %v343_v38 = vrot.slane %v341_v27, 4  ;;  %v349_v39 = vrot.slane %v347_v28, 5  ;;  %v3816_v7 = vld [vmem:[%s3744_s28 + $0x8] sm:$0x1] }
  0x26   : > { %v334_v40 = vor.u32 %v333_v32, %v330_v22  ;;  %v378_v42 = vrot.slane %v376_v34, 4  ;;  %v381_v43 = vrot.slane %v379_v35, 5  ;;  %v385_v44 = vshll.u32 %v207_v29, 16  ;;  %v3819_v8 = vld [vmem:[%s3744_s28 + $0x24] sm:$0xf]  ;;  %v3311_v9 = vld [vmem:[%s4765_s1 + $0x48] sm:$0xff] }
  0x27   : > { %v292_v45 = vsel %vm3784_vm2, %v287_v36, %v291_v18  ;;  %v302_v46 = vsel %vm3784_vm2, %v297_v37, %v301_v21  ;;  %v344_v47 = vor.u32 %v343_v38, %v339_v33  ;;  %v389_v48 = vshrl.u32 %v207_v29, 16  ;;  %3450 = vmatpush.bf16.msra.mxu1 %v3313_v30  ;;  %3451 = vmatpush.bf16.msra.mxu2 %v3313_v30  ;;  %v3834_v21 = vld [vmem:[%s3744_s28 + $0x28] sm:$0xf]  ;;  %v3840_v25 = vld [vmem:[%s3744_s28 + $0x2c] sm:$0x1]  ;;  %v3325_v38 = vld [vmem:[%s4765_s1 + $0xb8] sm:$0xff] }
  0x28   : > { %v3799_v51 = vunpack.c.l.b16 %v292_v45  ;;  %v3801_v52 = vunpack.c.l.b16 %v302_v46  ;;  %v335_v53 = vrot.slane %v334_v40, 4  ;;  %v382_v54 = vor.u32 %v381_v43, %v378_v42  ;;  %3452 = vmatpush.bf16.msra.mxu3 %v3313_v30  ;;  %524 = vmatpush.bf16.msra.mxu0 %v3313_v30  ;;  %v3847_v32 = vld [vmem:[%s3744_s28 + $0x3c] sm:$0xf]  ;;  %s3290_s5 = sshll.u32 %s2596_s4, 2  ;;  %s2584_s9 = scalar_lea.sflag [#allocation3], %s175_s20 }
  0x29   : > { %v345_v55 = vrot.slane %v344_v47, 4  ;;  %v387_v56 = vrot.slane %v385_v44, 5  ;;  %v391_v57 = vrot.slane %v389_v48, 4  ;;  %v395_v58 = vshll.u32 %v208_v41, 16  ;;  %v3309_v44 = vld [vmem:[%s4765_s1 + $0x38] sm:$0xff]  ;;  %s2598_s6 = scalar_lea.hbm %s4767_s3, %s3290_s5  ;;  %s3560_s27 = scalar_lea.hbm %s4767_s3, 256 }
  0x2a   : > { %v458_v59 = vpack.c.b16 %v3801_v52, %v3799_v51  ;;  %v340_v60 = vsel %vm3784_vm2, %v335_v53, %v339_v33  ;;  %v383_v61 = vrot.slane %v382_v54, 4  ;;  %v232_v63 = vshrl.u32 %v3794_v49, 16  ;;  %v3310_v33 = vld [vmem:[%s4765_s1 + $0x40] sm:$0xff]  ;;  %v3348_v51 = vld [vmem:[%s4765_s1 + $0x130] sm:$0xff]  ;;  %s2601_s8 = sshll.u32 %s2598_s6, 4  ;;  %s2602_s8 = int_to_ptr.hbm [resolvable:$true] %s2601_s8 }
  0x2b   : > { %v350_v0 = vsel %vm3784_vm2, %v345_v55, %v349_v39  ;;  %v3813_v1 = vunpack.c.l.b16 %v340_v60  ;;  %v392_v2 = vor.u32 %v391_v57, %v387_v56  ;;  %v397_v3 = vrot.slane %v395_v58, 5  ;;  %3453 = vmatpush.bf16.msra.mxu1 %v3312_v50  ;;  %3454 = vmatpush.bf16.msra.mxu2 %v3312_v50  ;;  %v3863_v47 = vld [vmem:[%s3744_s28 + $0x40] sm:$0xf]  ;;  %v3349_v58 = vld [vmem:[%s4765_s1 + $0x138] sm:$0xff]  ;;  %s3554_s10 = sshra.s32 %s2602_s8, 4  ;;  %s3555_s10 = int_to_ptr.hbm [resolvable:$true] %s3554_s10 }
  0x2c   : > { %v3824_v10 = vunpack.c.l.b16 %v350_v0  ;;  %v388_v12 = vsel %vm3784_vm2, %v383_v61, %v387_v56  ;;  %v234_v15 = vrot.slane %v232_v63, 4  ;;  %v235_v16 = vshll.u32 %v3794_v49, 16  ;;  %3455 = vmatpush.bf16.msra.mxu3 %v3312_v50  ;;  %525 = vmatpush.bf16.msra.mxu0 %v3312_v50  ;;  %v3867_v56 = vld [vmem:[%s3744_s28 + $0x44] sm:$0x1]  ;;  %v3876_v0 = vld [vmem:[%s3744_s28 + $0x54] sm:$0xf]  ;;  %p3561_p2 = scmp.lt.s32.totalorder %s3555_s10, %s4767_s3 }
  0x2d   : > { %v393_v17 = vrot.slane %v392_v2, 4  ;;  %v3829_v18 = vunpack.c.l.b16 %v388_v12  ;;  %v241_v19 = vshll.u32 %v3808_v62, 16  ;;  %v245_v20 = vshrl.u32 %v3808_v62, 16 }
  0x2e   : > { %v460_v22 = vpack.c.b16 %v3824_v10, %v3813_v1  ;;  %v237_v23 = vrot.slane %v235_v16, 5  ;;  %v251_v24 = vshll.u32 %v3816_v7, 16  ;;  %v304_v26 = vshrl.u32 %v3819_v8, 16  ;;  %v3341_v1 = vld [vmem:[%s4765_s1 + $0xf8] sm:$0xff] }
  0x2f   : > { %v398_v27 = vsel %vm3784_vm2, %v393_v17, %v397_v3  ;;  %v243_v28 = vrot.slane %v241_v19, 5  ;;  %v247_v29 = vrot.slane %v245_v20, 4  ;;  %v307_v30 = vshll.u32 %v3819_v8, 16  ;;  %3456 = vmatpush.bf16.msra.mxu1 %v3311_v9  ;;  %3457 = vmatpush.bf16.msra.mxu2 %v3311_v9  ;;  %v3308_v19 = vld [vmem:[%s4765_s1 + $0x30] sm:$0xff] }
  0x30   : > { %v453_v34 = vunpack.c.l.b16 %v398_v27  ;;  %v238_v35 = vor.u32 %v237_v23, %v234_v15  ;;  %v253_v36 = vrot.slane %v251_v24, 5  ;;  %v306_v37 = vrot.slane %v304_v26, 4  ;;  %3458 = vmatpush.bf16.msra.mxu3 %v3311_v9  ;;  %526 = vmatpush.bf16.msra.mxu0 %v3311_v9  ;;  %v3324_v15 = vld [vmem:[%s4765_s1 + $0xb0] sm:$0xff]  ;;  %v3898_v26 = vld [vmem:[%s3744_s28 + $0x58] sm:$0xf] }
  0x31   : > { %v248_v39 = vor.u32 %v247_v29, %v243_v28  ;;  %v309_v40 = vrot.slane %v307_v30, 5  ;;  %v313_v41 = vshll.u32 %v3834_v21, 16  ;;  %v317_v42 = vshrl.u32 %v3834_v21, 16  ;;  %v3908_v29 = vld [vmem:[%s3744_s28 + $0xc] sm:$0xf]  ;;  %v3340_v30 = vld [vmem:[%s4765_s1 + $0xf0] sm:$0xff] }
  0x32   : > { %v462_v43 = vpack.c.b16 %v453_v34, %v3829_v18  ;;  %v239_v45 = vrot.slane %v238_v35, 4  ;;  %v323_v46 = vshll.u32 %v3840_v25, 16  ;;  %v352_v48 = vshrl.u32 %v3847_v32, 16 }
  0x33   : > { %v249_v50 = vrot.slane %v248_v39, 4  ;;  %v310_v53 = vor.u32 %v309_v40, %v306_v37  ;;  %v315_v54 = vrot.slane %v313_v41, 5  ;;  %v319_v55 = vrot.slane %v317_v42, 4  ;;  %3459 = vmatpush.bf16.msra.mxu1 %v3310_v33  ;;  %3460 = vmatpush.bf16.msra.mxu2 %v3310_v33  ;;  %v3323_v37 = vld [vmem:[%s4765_s1 + $0xa8] sm:$0xff] }
  0x34   : > { %v244_v57 = vsel %vm3784_vm2, %v239_v45, %v243_v28  ;;  %v325_v60 = vrot.slane %v323_v46, 5  ;;  %v354_v61 = vrot.slane %v352_v48, 4  ;;  %v355_v63 = vshll.u32 %v3847_v32, 16  ;;  %3461 = vmatpush.bf16.msra.mxu3 %v3310_v33  ;;  %527 = vmatpush.bf16.msra.mxu0 %v3310_v33  ;;  %v3307_v42 = vld [vmem:[%s4765_s1 + $0x28] sm:$0xff]  ;;  %v3928_v46 = vld [vmem:[%s3744_s28 + $0x10] sm:$0xf] }
  0x35   : > { %v254_v2 = vsel %vm3784_vm2, %v249_v50, %v253_v36  ;;  %v440_v3 = vunpack.c.l.b16 %v244_v57  ;;  %v311_v9 = vrot.slane %v310_v53, 4  ;;  %v320_v10 = vor.u32 %v319_v55, %v315_v54  ;;  %v3347_v50 = vld [vmem:[%s4765_s1 + $0x128] sm:$0xff] }
  0x36   : > { %v441_v12 = vunpack.c.l.b16 %v254_v2  ;;  %v357_v16 = vrot.slane %v355_v63, 5  ;;  %v361_v17 = vshll.u32 %v3863_v47, 16  ;;  %v365_v18 = vshrl.u32 %v3863_v47, 16  ;;  %538 = vmatmul.bf16.vlgmr.msra.gmra.mxu1 %v458_v59  ;;  %548 = vmatmul.bf16.vlgmr.msra.gmra.mxu2 %v460_v22  ;;  %v3905_v22 = vld [vmem:[%s3744_s28 + $0x5c] sm:$0x1] }
  0x37   : > { %878 = vmatpush.bf16.msrb.mxu2 %v3325_v38  ;;  %665 = vmatpush.bf16.msrb.mxu1 %v3309_v44  ;;  %v316_v20 = vsel %vm3784_vm2, %v311_v9, %v315_v54  ;;  %v321_v23 = vrot.slane %v320_v10, 4  ;;  %v371_v24 = vshll.u32 %v3867_v56, 16  ;;  %v400_v27 = vshrl.u32 %v3876_v0, 16 }
  0x38   : > { %558 = vmatmul.bf16.vlgmr.msra.gmra.mxu3 %v462_v43  ;;  %v456_v28 = vpack.c.b16 %v441_v12, %v440_v3  ;;  %1438 = vmatpush.bf16.msrb.mxu0 %v3349_v58  ;;  %v358_v52 = vor.u32 %v357_v16, %v354_v61  ;;  %v363_v59 = vrot.slane %v361_v17, 5  ;;  %v3915_v34 = vunpack.c.l.b16 %v316_v20  ;;  %v3939_v58 = vld [vmem:[%s3744_s28 + $0x14] sm:$0x1]  ;;  %v3322_v3 = vld [vmem:[%s4765_s1 + $0xa0] sm:$0xff] }
  0x39   : > { %1084 = vmatpush.bf16.msrb.mxu3 %v3341_v1  ;;  %v326_v33 = vsel %vm3784_vm2, %v321_v23, %v325_v60  ;;  %v367_v35 = vrot.slane %v365_v18, 4  ;;  %v373_v36 = vrot.slane %v371_v24, 5  ;;  %v402_v39 = vrot.slane %v400_v27, 4  ;;  %v3339_v60 = vld [vmem:[%s4765_s1 + $0xe8] sm:$0xff]  ;;  %v3306_v16 = vld [vmem:[%s4765_s1 + $0x20] sm:$0xff] }
  0x3a   : > { %528 = vmatmul.bf16.vlgmr.msra.gmra.mxu0 %v456_v28  ;;  %v359_v38 = vrot.slane %v358_v52, 4  ;;  %v403_v40 = vshll.u32 %v3876_v0, 16  ;;  %v409_v41 = vshll.u32 %v3898_v26, 16  ;;  %v413_v44 = vshrl.u32 %v3898_v26, 16  ;;  %v3346_v23 = vld [vmem:[%s4765_s1 + $0x120] sm:$0xff] }
  0x3b   : > { %879 = vmatpush.bf16.msrb.mxu2 %v3324_v15  ;;  %666 = vmatpush.bf16.msrb.mxu1 %v3308_v19  ;;  %v368_v43 = vor.u32 %v367_v35, %v363_v59  ;;  %v419_v45 = vshll.u32 %v3905_v22, 16  ;;  %v256_v48 = vshrl.u32 %v3908_v29, 16  ;;  %v3934_v53 = vunpack.c.l.b16 %v326_v33  ;;  %v3338_v52 = vld [vmem:[%s4765_s1 + $0xe0] sm:$0xff] }
  0x3c   : > { %1439 = vmatpush.bf16.msrb.mxu0 %v3348_v51  ;;  %v364_v54 = vsel %vm3784_vm2, %v359_v38, %v363_v59  ;;  %v405_v55 = vrot.slane %v403_v40, 5  ;;  %v411_v57 = vrot.slane %v409_v41, 5  ;;  %v415_v1 = vrot.slane %v413_v44, 4  ;;  %v3973_v40 = vld [vmem:[%s3744_s28 + $0x10] sm:$0xf] }
  0x3d   : > { %1085 = vmatpush.bf16.msrb.mxu3 %v3340_v30  ;;  %v369_v61 = vrot.slane %v368_v43, 4  ;;  %v450_v63 = vunpack.c.l.b16 %v364_v54  ;;  %v421_v2 = vrot.slane %v419_v45, 5  ;;  %v258_v10 = vrot.slane %v256_v48, 4  ;;  %v3305_v45 = vld [vmem:[%s4765_s1 + $0x18] sm:$0xff] }
  0x3e   : > { %v406_v9 = vor.u32 %v405_v55, %v402_v39  ;;  %v259_v12 = vshll.u32 %v3908_v29, 16  ;;  %v265_v15 = vshll.u32 %v3928_v46, 16  ;;  %v416_v18 = vor.u32 %v415_v1, %v411_v57  ;;  %v3970_v39 = vld [vmem:[%s3744_s28 + $0xc] sm:$0xf]  ;;  %v3345_v55 = vld [vmem:[%s4765_s1 + $0x118] sm:$0xff]  ;;  %v3320_v1 = vld [vmem:[%s4765_s1 + $0x90] sm:$0xff] }
  0x3f   : > { %880 = vmatpush.bf16.msrb.mxu2 %v3323_v37  ;;  %667 = vmatpush.bf16.msrb.mxu1 %v3307_v42  ;;  %v374_v17 = vsel %vm3784_vm2, %v369_v61, %v373_v36  ;;  %v269_v19 = vshrl.u32 %v3928_v46, 16  ;;  %v275_v20 = vshll.u32 %v3939_v58, 16  ;;  %v459_v33 = vpack.c.b16 %v3934_v53, %v3915_v34  ;;  %v3321_v36 = vld [vmem:[%s4765_s1 + $0x98] sm:$0xff] }
  0x40   : > { %1440 = vmatpush.bf16.msrb.mxu0 %v3347_v50  ;;  %v451_v24 = vunpack.c.l.b16 %v374_v17  ;;  %v407_v27 = vrot.slane %v406_v9, 4  ;;  %v261_v28 = vrot.slane %v259_v12, 5  ;;  %v267_v51 = vrot.slane %v265_v15, 5  ;;  %v3337_v53 = vld [vmem:[%s4765_s1 + $0xd8] sm:$0xff] }
  0x41   : > { %1086 = vmatpush.bf16.msrb.mxu3 %v3339_v60  ;;  %v417_v59 = vrot.slane %v416_v18, 4  ;;  %v271_v30 = vrot.slane %v269_v19, 4  ;;  %v277_v38 = vrot.slane %v275_v20, 5  ;;  %v727_v50 = vrot.slane %v3808_v62, 5  ;;  %v3336_v20 = vld [vmem:[%s4765_s1 + $0xd0] sm:$0xff] }
  0x42   : > { %v412_v35 = vsel %vm3784_vm2, %v407_v27, %v411_v57  ;;  %v262_v37 = vor.u32 %v261_v28, %v258_v10  ;;  %v461_v41 = vpack.c.b16 %v451_v24, %v450_v63  ;;  %v1150_v57 = vshrl.u32 %v3970_v39, 16 }
  0x43   : > { %881 = vmatpush.bf16.msrb.mxu2 %v3322_v3  ;;  %668 = vmatpush.bf16.msrb.mxu1 %v3306_v16  ;;  %v422_v42 = vsel %vm3784_vm2, %v417_v59, %v421_v2  ;;  %v454_v43 = vunpack.c.l.b16 %v412_v35  ;;  %v272_v34 = vor.u32 %v271_v30, %v267_v51  ;;  %v1153_v60 = vshll.u32 %v3970_v39, 16  ;;  %v3996_v2 = vld [vmem:[%s3744_s28 + $0x14] sm:$0x1]  ;;  %v3303_v30 = vld [vmem:[%s4765_s1 + $0x8] sm:$0xff] }
  0x44   : > { %1441 = vmatpush.bf16.msrb.mxu0 %v3346_v23  ;;  %v455_v44 = vunpack.c.l.b16 %v422_v42  ;;  %v263_v48 = vrot.slane %v262_v37, 4  ;;  %v1159_v61 = vshll.u32 %v3973_v40, 16  ;;  %v2810_v10 = vrot.slane %v3794_v49, 9  ;;  %v3304_v16 = vld [vmem:[%s4765_s1 + $0x10] sm:$0xff]  ;;  %v3343_v35 = vld [vmem:[%s4765_s1 + $0x108] sm:$0xff] }
  0x45   : > { %1087 = vmatpush.bf16.msrb.mxu3 %v3338_v52  ;;  %v273_v54 = vrot.slane %v272_v34, 4  ;;  %v1152_v12 = vrot.slane %v1150_v57, 4  ;;  %v729_v17 = vrot.slane %v727_v50, 4  ;;  %v730_v18 = vrot.slane %v3816_v7, 5  ;;  %v3344_v49 = vld [vmem:[%s4765_s1 + $0x110] sm:$0xff] }
  0x46   : > { %v463_v63 = vpack.c.b16 %v455_v44, %v454_v43  ;;  %v268_v62 = vsel %vm3784_vm2, %v263_v48, %v267_v51  ;;  %543 = vmatmul.bf16.gmra.mxu1 %v459_v33  ;;  %553 = vmatmul.bf16.gmra.mxu2 %v461_v41  ;;  %v1155_v19 = vrot.slane %v1153_v60, 5  ;;  %v1161_v24 = vrot.slane %v1159_v61, 5  ;;  %v3319_v51 = vld [vmem:[%s4765_s1 + $0x88] sm:$0xff]  ;;  %v4036_v43 = vld [vmem:[%s3744_s28 + $0x18] sm:$0xf]  ;;  %v3318_v44 = vld [vmem:[%s4765_s1 + $0x80] sm:$0xff] }
  0x47   : > { %882 = vmatpush.bf16.msrb.mxu2 %v3321_v36  ;;  %v278_v3 = vsel %vm3784_vm2, %v273_v54, %v277_v38  ;;  %v442_v9 = vunpack.c.l.b16 %v268_v62  ;;  %669 = vmatpush.bf16.msrb.mxu1 %v3305_v45  ;;  %v1163_v7 = vshrl.u32 %v3973_v40, 16  ;;  %v1169_v27 = vshll.u32 %v3996_v2, 16  ;;  %v3335_v33 = vld [vmem:[%s4765_s1 + $0xc8] sm:$0xff]  ;;  %v4039_v34 = vld [vmem:[%s3744_s28 + $0x1c] sm:$0xf]  ;;  %v3302_v54 = vld [vmem:[%s4765_s1] sm:$0xff] }
  0x48   : > { %563 = vmatmul.bf16.gmra.mxu3 %v463_v63  ;;  %v443_v15 = vunpack.c.l.b16 %v278_v3  ;;  %1442 = vmatpush.bf16.msrb.mxu0 %v3345_v55  ;;  %v1156_v52 = vor.u32 %v1155_v19, %v1152_v12  ;;  %v728_v36 = vsel %vm4013_vm5, %v2810_v10, %v727_v50  ;;  %v731_v37 = vsel %vm4013_vm5, %v729_v17, %v730_v18  ;;  %v3373_v50 = vld [vmem:[%s4765_s1 + $0x1b8] sm:$0xff]  ;;  %v3334_v61 = vld [vmem:[%s4765_s1 + $0xc0] sm:$0xff] }
  0x49   : > { %1088 = vmatpush.bf16.msrb.mxu3 %v3337_v53  ;;  %v1165_v59 = vrot.slane %v1163_v7, 4  ;;  %v1171_v42 = vrot.slane %v1169_v27, 5  ;;  %v798_v45 = vunpack.c.l.b16 %v728_v36  ;;  %v799_v48 = vunpack.c.l.b16 %v731_v37  ;;  %v3342_v63 = vld [vmem:[%s4765_s1 + $0x100] sm:$0xff]  ;;  %v3381_v10 = vld [vmem:[%s4765_s1 + $0x1f8] sm:$0xff] }
  0x4a   : > { %v457_v28 = vpack.c.b16 %v443_v15, %v442_v9  ;;  %v1157_v38 = vrot.slane %v1156_v52, 4  ;;  %v1174_v55 = vshrl.u32 %v4036_v43, 16  ;;  %v1177_v57 = vshll.u32 %v4036_v43, 16  ;;  %v3357_v12 = vld [vmem:[%s4765_s1 + $0x178] sm:$0xff] }
  0x4b   : > { %883 = vmatpush.bf16.msrb.mxu2 %v3320_v1  ;;  %670 = vmatpush.bf16.msrb.mxu1 %v3304_v16  ;;  %v1166_v41 = vor.u32 %v1165_v59, %v1161_v24  ;;  %v1183_v60 = vshll.u32 %v4039_v34, 16  ;;  %v1187_v3 = vshrl.u32 %v4039_v34, 16  ;;  %v741_v9 = vrot.slane %v3753_v5, 5  ;;  %v3294_v16 = vld [vmem:[%s3744_s28] sm:$0xff]  ;;  %v3326_v5 = vld [vmem:[%s3744_s28 + $0xc] sm:$0xff]  ;;  %v3389_v7 = vld [vmem:[%s4765_s1 + $0x238] sm:$0xff] }
  0x4c   : > { %533 = vmatmul.bf16.gmra.mxu0 %v457_v28  ;;  %v1162_v62 = vsel %vm3784_vm2, %v1157_v38, %v1161_v24  ;;  %v734_v15 = vrot.slane %v3928_v46, 5  ;;  %v814_v17 = vpack.c.b16 %v799_v48, %v798_v45  ;;  %v2812_v18 = vrot.slane %v3750_v4, 9  ;;  %v3372_v4 = vld [vmem:[%s4765_s1 + $0x1b0] sm:$0xff] }
  0x4d   : > { %1089 = vmatpush.bf16.msrb.mxu3 %v3336_v20  ;;  %1443 = vmatpush.bf16.msrb.mxu0 %v3344_v49  ;;  %v1167_v53 = vrot.slane %v1166_v41, 4  ;;  %v743_v19 = vrot.slane %v741_v9, 4  ;;  %v744_v20 = vrot.slane %v3756_v6, 5  ;;  %v1358_v49 = vunpack.c.l.b16 %v1162_v62 }
  0x4e   : > { %v1176_v27 = vrot.slane %v1174_v55, 4  ;;  %v1179_v28 = vrot.slane %v1177_v57, 5  ;;  %v4082_v46 = vrot.slane %v1183_v60, 5  ;;  %v1189_v6 = vrot.slane %v1187_v3, 4  ;;  %v4114_v55 = vld [vmem:[%s3744_s28 + $0x24] sm:$0xf] }
  0x4f   : > { %884 = vmatpush.bf16.msrb.mxu2 %v3319_v51  ;;  %671 = vmatpush.bf16.msrb.mxu1 %v3303_v30  ;;  %v1172_v1 = vsel %vm3784_vm2, %v1167_v53, %v1171_v42  ;;  %v742_v51 = vsel %vm4013_vm5, %v2812_v18, %v741_v9  ;;  %v745_v52 = vsel %vm4013_vm5, %v743_v19, %v744_v20  ;;  %v2811_v59 = vrot.slane %v3908_v29, 9  ;;  %v4090_v30 = vld [vmem:[%s3744_s28 + $0x20] sm:$0x1]  ;;  %v4117_v57 = vld [vmem:[%s3744_s28 + $0x28] sm:$0xf] }
  0x50   : > { %v1359_v24 = vunpack.c.l.b16 %v1172_v1  ;;  %v802_v36 = vunpack.c.l.b16 %v742_v51  ;;  %v803_v37 = vunpack.c.l.b16 %v745_v52  ;;  %v736_v38 = vrot.slane %v734_v15, 4  ;;  %v3379_v60 = vld [vmem:[%s4765_s1 + $0x1e8] sm:$0xff]  ;;  %v3327_v52 = vld [vmem:[%s3744_s28 + $0x18] sm:$0xff] }
  0x51   : > { %1090 = vmatpush.bf16.msrb.mxu3 %v3335_v33  ;;  %1444 = vmatpush.bf16.msrb.mxu0 %v3343_v35  ;;  %v3380_v33 = vld [vmem:[%s4765_s1 + $0x1f0] sm:$0xff]  ;;  %v737_v41 = vrot.slane %v3939_v58, 5  ;;  %v1190_v45 = vor.u32 %v1189_v6, %v4082_v46  ;;  %v1193_v48 = vshll.u32 %v4090_v30, 16  ;;  %v3371_v58 = vld [vmem:[%s4765_s1 + $0x1a8] sm:$0xff]  ;;  %v735_v53 = vsel %vm4013_vm5, %v2811_v59, %v734_v15 }
  0x52   : > { %v3356_v35 = vld [vmem:[%s4765_s1 + $0x170] sm:$0xff]  ;;  %v1374_v29 = vpack.c.b16 %v1359_v24, %v1358_v49  ;;  %v4099_v42 = vpack.c.b16 %v803_v37, %v802_v36  ;;  %v3387_v9 = vld [vmem:[%s4765_s1 + $0x228] sm:$0xff]  ;;  %v1201_v15 = vshll.u32 %v4114_v55, 16  ;;  %v748_v20 = vrot.slane %v3834_v21, 5 }
  0x53   : > { %885 = vmatpush.bf16.msrb.mxu2 %v3318_v44  ;;  %672 = vmatpush.bf16.msrb.mxu1 %v3302_v54  ;;  %v1180_v44 = vor.u32 %v1179_v28, %v1176_v27  ;;  %v738_v54 = vsel %vm4013_vm5, %v736_v38, %v737_v41  ;;  %v1191_v1 = vrot.slane %v1190_v45, 4  ;;  %v1195_v3 = vrot.slane %v1193_v48, 5  ;;  %v3295_v27 = vld [vmem:[%s3744_s28 + $0xc] sm:$0xff] }
  0x54   : > { %v1203_v24 = vrot.slane %v1201_v15, 5  ;;  %v750_v6 = vrot.slane %v748_v20, 4  ;;  %v751_v51 = vrot.slane %v3840_v25, 5 }
  0x55   : > { %1091 = vmatpush.bf16.msrb.mxu3 %v3334_v61  ;;  %1445 = vmatpush.bf16.msrb.mxu0 %v3342_v63  ;;  %v3355_v61 = vld [vmem:[%s4765_s1 + $0x168] sm:$0xff]  ;;  %v800_v63 = vunpack.c.l.b16 %v735_v53  ;;  %v1181_v62 = vrot.slane %v1180_v44, 4  ;;  %v1196_v19 = vsel %vm3784_vm2, %v1191_v1, %v1195_v3  ;;  %v3370_v44 = vld [vmem:[%s4765_s1 + $0x1a0] sm:$0xff] }
  0x56   : > { %673 = vmatmul.bf16.vlgmr.msrb.gmra.mxu1 %v3294_v16  ;;  %886 = vmatmul.bf16.vlgmr.msrb.gmra.mxu2 %v814_v17  ;;  %v1207_v16 = vshll.u32 %v4117_v57, 16  ;;  %v1211_v17 = vshrl.u32 %v4117_v57, 16  ;;  %v1361_v59 = vunpack.c.l.b16 %v1196_v19  ;;  %v752_v21 = vsel %vm4013_vm5, %v750_v6, %v751_v51  ;;  %v3354_v53 = vld [vmem:[%s4765_s1 + $0x160] sm:$0xff] }
  0x57   : > { %1870 = vmatpush.bf16.msra.mxu2 %v3373_v50  ;;  %1664 = vmatpush.bf16.msra.mxu1 %v3357_v12  ;;  %v3388_v50 = vld [vmem:[%s4765_s1 + $0x230] sm:$0xff]  ;;  %v1198_v12 = vshrl.u32 %v4114_v55, 16  ;;  %v1186_v18 = vsel %vm3784_vm2, %v1181_v62, %v4082_v46  ;;  %v805_v37 = vunpack.c.l.b16 %v752_v21  ;;  %v4201_v21 = vld [vmem:[%s3744_s28 + $0x40] sm:$0xf] }
  0x58   : > { %1092 = vmatmul.bf16.vlgmr.msrb.gmra.mxu3 %v3326_v5  ;;  %v1213_v28 = vrot.slane %v1211_v17, 4  ;;  %v1360_v46 = vunpack.c.l.b16 %v1186_v18  ;;  %v3328_v17 = vld [vmem:[%s3744_s28 + $0x24] sm:$0xff] }
  0x59   : > { %2224 = vmatpush.bf16.msra.mxu3 %v3381_v10  ;;  %2450 = vmatpush.bf16.msra.mxu0 %v3389_v7  ;;  %v801_v10 = vunpack.c.l.b16 %v738_v54  ;;  %v1200_v49 = vrot.slane %v1198_v12, 4  ;;  %v1209_v7 = vrot.slane %v1207_v16, 5  ;;  %v3386_v54 = vld [vmem:[%s4765_s1 + $0x220] sm:$0xff]  ;;  %v3296_v12 = vld [vmem:[%s3744_s28 + $0x18] sm:$0xff] }
  0x5a   : > { %v1375_v41 = vpack.c.b16 %v1361_v59, %v1360_v46  ;;  %v3353_v46 = vld [vmem:[%s4765_s1 + $0x158] sm:$0xff] }
  0x5b   : > { %1871 = vmatpush.bf16.msra.mxu2 %v3372_v4  ;;  %1665 = vmatpush.bf16.msra.mxu1 %v3356_v35  ;;  %v815_v5 = vpack.c.b16 %v801_v10, %v800_v63  ;;  %v2813_v4 = vrot.slane %v3819_v8, 9  ;;  %v1204_v8 = vor.u32 %v1203_v24, %v1200_v49  ;;  %v1214_v38 = vor.u32 %v1213_v28, %v1209_v7  ;;  %v4181_v49 = vld [vmem:[%s3744_s28 + $0x38] sm:$0x1] }
  0x5c   : > { %1446 = vmatmul.bf16.vlgmr.msrb.gmra.mxu0 %v1374_v29  ;;  %v1241_v28 = vshll.u32 %v4181_v49, 16  ;;  %v3385_v59 = vld [vmem:[%s4765_s1 + $0x218] sm:$0xff] }
  0x5d   : > { %2225 = vmatpush.bf16.msra.mxu3 %v3380_v33  ;;  %2451 = vmatpush.bf16.msra.mxu0 %v3388_v50  ;;  %v4143_v33 = vld [vmem:[%s3744_s28 + $0x2c] sm:$0x1]  ;;  %v749_v35 = vsel %vm4013_vm5, %v2813_v4, %v748_v20  ;;  %v1205_v45 = vrot.slane %v1204_v8, 4  ;;  %v1215_v48 = vrot.slane %v1214_v38, 4  ;;  %v3369_v4 = vld [vmem:[%s4765_s1 + $0x198] sm:$0xff] }
  0x5e   : > { %v804_v36 = vunpack.c.l.b16 %v749_v35  ;;  %v1217_v25 = vshll.u32 %v4143_v33, 16  ;;  %v4198_v35 = vld [vmem:[%s3744_s28 + $0x3c] sm:$0xf] }
  0x5f   : > { %1872 = vmatpush.bf16.msra.mxu2 %v3371_v58  ;;  %1666 = vmatpush.bf16.msra.mxu1 %v3355_v61  ;;  %v3378_v58 = vld [vmem:[%s4765_s1 + $0x1e0] sm:$0xff]  ;;  %v4168_v61 = vld [vmem:[%s3744_s28 + $0x34] sm:$0xf]  ;;  %v1210_v63 = vsel %vm3784_vm2, %v1205_v45, %v1209_v7  ;;  %v1246_v8 = vshrl.u32 %v4198_v35, 16  ;;  %v1249_v38 = vshll.u32 %v4198_v35, 16  ;;  %v755_v45 = vrot.slane %v3767_v13, 5 }
  0x60   : > { %v4150_v29 = vpack.c.b16 %v805_v37, %v804_v36  ;;  %v1219_v50 = vrot.slane %v1217_v25, 5  ;;  %v1235_v10 = vshrl.u32 %v4168_v61, 16  ;;  %v1362_v15 = vunpack.c.l.b16 %v1210_v63 }
  0x61   : > { %2226 = vmatpush.bf16.msra.mxu3 %v3379_v60  ;;  %2452 = vmatpush.bf16.msra.mxu0 %v3387_v9  ;;  %v4165_v60 = vld [vmem:[%s3744_s28 + $0x30] sm:$0xf]  ;;  %v1231_v9 = vshll.u32 %v4168_v61, 16  ;;  %v1255_v25 = vshll.u32 %v4201_v21, 16 }
  0x62   : > { %v1220_v62 = vsel %vm3784_vm2, %v1215_v48, %v1219_v50  ;;  %v1222_v1 = vshrl.u32 %v4165_v60, 16  ;;  %v1225_v3 = vshll.u32 %v4165_v60, 16  ;;  %v3329_v48 = vld [vmem:[%s3744_s28 + $0x30] sm:$0xff] }
  0x63   : > { %1873 = vmatpush.bf16.msra.mxu2 %v3370_v44  ;;  %1667 = vmatpush.bf16.msra.mxu1 %v3354_v53  ;;  %v1363_v16 = vunpack.c.l.b16 %v1220_v62  ;;  %v1233_v20 = vrot.slane %v1231_v9, 5  ;;  %v3297_v44 = vld [vmem:[%s3744_s28 + $0x24] sm:$0xff]  ;;  %v1248_v53 = vrot.slane %v1246_v8, 4  ;;  %v1257_v63 = vrot.slane %v1255_v25, 5 }
  0x64   : > { %v1224_v18 = vrot.slane %v1222_v1, 4  ;;  %v1227_v19 = vrot.slane %v1225_v3, 5  ;;  %v4215_v1 = vld [vmem:[%s3744_s28 + $0x44] sm:$0x1]  ;;  %v2814_v3 = vrot.slane %v3763_v11, 9  ;;  %v757_v9 = vrot.slane %v755_v45, 4 }
  0x65   : > { %2227 = vmatpush.bf16.msra.mxu3 %v3378_v58  ;;  %2453 = vmatpush.bf16.msra.mxu0 %v3386_v54  ;;  %v1376_v24 = vpack.c.b16 %v1363_v16, %v1362_v15  ;;  %v1251_v54 = vrot.slane %v1249_v38, 5 }
  0x66   : > { %678 = vmatmul.bf16.gmra.mxu1 %v3295_v27  ;;  %891 = vmatmul.bf16.gmra.mxu2 %v815_v5  ;;  %v1237_v5 = vrot.slane %v1235_v10, 4  ;;  %v1228_v7 = vor.u32 %v1227_v19, %v1224_v18  ;;  %v758_v10 = vrot.slane %v3770_v14, 5  ;;  %v756_v18 = vsel %vm4013_vm5, %v2814_v3, %v755_v45  ;;  %v4232_v14 = vld [vmem:[%s3744_s28 + $0x4c] sm:$0xf]  ;;  %v3376_v19 = vld [vmem:[%s4765_s1 + $0x1d0] sm:$0xff] }
  0x67   : > { %1874 = vmatpush.bf16.msra.mxu2 %v3369_v4  ;;  %1668 = vmatpush.bf16.msra.mxu1 %v3353_v46  ;;  %v1252_v15 = vor.u32 %v1251_v54, %v1248_v53  ;;  %v2815_v3 = vrot.slane %v3847_v32, 9  ;;  %v3375_v32 = vld [vmem:[%s4765_s1 + $0x1c8] sm:$0xff] }
  0x68   : > { %1097 = vmatmul.bf16.gmra.mxu3 %v3327_v52  ;;  %v1238_v27 = vor.u32 %v1237_v5, %v1233_v20  ;;  %v1229_v6 = vrot.slane %v1228_v7, 4  ;;  %v1243_v52 = vrot.slane %v1241_v28, 5  ;;  %v759_v11 = vsel %vm4013_vm5, %v757_v9, %v758_v10  ;;  %v3384_v5 = vld [vmem:[%s4765_s1 + $0x210] sm:$0xff] }
  0x69   : > { %2454 = vmatpush.bf16.msra.mxu0 %v3385_v59  ;;  %v806_v28 = vunpack.c.l.b16 %v756_v18  ;;  %v807_v4 = vunpack.c.l.b16 %v759_v11  ;;  %v765_v10 = vrot.slane %v3867_v56, 5  ;;  %v3351_v56 = vld [vmem:[%s4765_s1 + $0x148] sm:$0xff]  ;;  %v4274_v18 = vld [vmem:[%s3744_s28 + $0x54] sm:$0xf]  ;;  %v4277_v11 = vld [vmem:[%s3744_s28 + $0x58] sm:$0xf] }
  0x6a   : > { %v1239_v51 = vrot.slane %v1238_v27, 4  ;;  %v1234_v36 = vsel %vm3784_vm2, %v1229_v6, %v1233_v20  ;;  %v3352_v20 = vld [vmem:[%s4765_s1 + $0x150] sm:$0xff] }
  0x6b   : > { %v1364_v50 = vunpack.c.l.b16 %v1234_v36  ;;  %1669 = vmatpush.bf16.msra.mxu1 %v3352_v20  ;;  %v818_v36 = vpack.c.b16 %v807_v4, %v806_v28  ;;  %v1297_v28 = vshll.u32 %v4274_v18, 16  ;;  %v1303_v4 = vshll.u32 %v4277_v11, 16 }
  0x6c   : > { %1451 = vmatmul.bf16.gmra.mxu0 %v1375_v41  ;;  %v1244_v37 = vsel %vm3784_vm2, %v1239_v51, %v1243_v52  ;;  %v1259_v41 = vshrl.u32 %v4201_v21, 16  ;;  %v1279_v52 = vshll.u32 %v4232_v14, 16 }
  0x6d   : > { %v1365_v58 = vunpack.c.l.b16 %v1244_v37  ;;  %2455 = vmatpush.bf16.msra.mxu0 %v3384_v5  ;;  %v3298_v37 = vld [vmem:[%s3744_s28 + $0x30] sm:$0xff] }
  0x6e   : > { %v1261_v62 = vrot.slane %v1259_v41, 4  ;;  %v1281_v25 = vrot.slane %v1279_v52, 5 }
  0x6f   : > { %v1377_v13 = vpack.c.b16 %v1365_v58, %v1364_v50  ;;  %v762_v50 = vrot.slane %v3863_v47, 5  ;;  %v4255_v58 = vld [vmem:[%s3744_s28 + $0x50] sm:$0x1]  ;;  %v3367_v47 = vld [vmem:[%s4765_s1 + $0x188] sm:$0xff]  ;;  %1670 = vmatpush.bf16.msra.mxu1 %v3351_v56  ;;  %v4313_v56 = vld [vmem:[%s3744_s28 + $0x60] sm:$0xf] }
  0x70   : > { %v1262_v16 = vor.u32 %v1261_v62, %v1257_v63 }
  0x71   : > { %v764_v9 = vrot.slane %v762_v50, 4 }
  0x72   : > { %v1263_v7 = vrot.slane %v1262_v16, 4  ;;  %v763_v16 = vsel %vm4013_vm5, %v2815_v3, %v762_v50 }
  0x76   : > { %683 = vmatmul.bf16.gmra.mxu1 %v3296_v12  ;;  %896 = vmatmul.bf16.gmra.mxu2 %v4099_v42  ;;  %v3377_v42 = vld [vmem:[%s4765_s1 + $0x1d8] sm:$0xff]  ;;  %v3368_v12 = vld [vmem:[%s4765_s1 + $0x190] sm:$0xff] }
  0x77   : > { %2228 = vmatpush.bf16.msra.mxu3 %v3377_v42  ;;  %1875 = vmatpush.bf16.msra.mxu2 %v3368_v12  ;;  %v1283_v42 = vshrl.u32 %v4232_v14, 16 }
  0x78   : > { %1102 = vmatmul.bf16.gmra.mxu3 %v3328_v17  ;;  %v1265_v17 = vshll.u32 %v4215_v1, 16 }
  0x79   : > { %v1285_v41 = vrot.slane %v1283_v42, 4 }
  0x7a   : > { %v1267_v27 = vrot.slane %v1265_v17, 5  ;;  %v766_v17 = vsel %vm4013_vm5, %v764_v9, %v765_v10  ;;  %v3366_v10 = vld [vmem:[%s4765_s1 + $0x180] sm:$0xff] }
  0x7b   : > { %2229 = vmatpush.bf16.msra.mxu3 %v3376_v19  ;;  %v1286_v54 = vor.u32 %v1285_v41, %v1281_v25  ;;  %1876 = vmatpush.bf16.msra.mxu2 %v3367_v47  ;;  %v808_v19 = vunpack.c.l.b16 %v763_v16  ;;  %v809_v20 = vunpack.c.l.b16 %v766_v17  ;;  %v3374_v17 = vld [vmem:[%s4765_s1 + $0x1c0] sm:$0xff] }
  0x7c   : > { %1456 = vmatmul.bf16.gmra.mxu0 %v1376_v24  ;;  %v1253_v24 = vrot.slane %v1252_v15, 4  ;;  %v1268_v59 = vsel %vm3784_vm2, %v1263_v7, %v1267_v27  ;;  %v3383_v7 = vld [vmem:[%s4765_s1 + $0x208] sm:$0xff]  ;;  %v1294_v27 = vshrl.u32 %v4274_v18, 16 }
  0x7d   : > { %v1287_v12 = vrot.slane %v1286_v54, 4  ;;  %2456 = vmatpush.bf16.msra.mxu0 %v3383_v7  ;;  %v819_v52 = vpack.c.b16 %v809_v20, %v808_v19  ;;  %v3539_v54 = vld [vmem:[%s3744_s28 + $0x50] sm:$0x1]  ;;  %v4316_v19 = vld [vmem:[%s3744_s28 + $0x64] sm:$0xf] }
  0x7e   : > { %v1258_v46 = vsel %vm3784_vm2, %v1253_v24, %v1257_v63  ;;  %v1289_v63 = vshll.u32 %v4255_v58, 16 }
  0x7f   : > { %v1366_v45 = vunpack.c.l.b16 %v1258_v46  ;;  %2230 = vmatpush.bf16.msra.mxu3 %v3375_v32  ;;  %1877 = vmatpush.bf16.msra.mxu2 %v3366_v10  ;;  %v3350_v32 = vld [vmem:[%s4765_s1 + $0x140] sm:$0xff] }
  0x80   : > { %v1291_v15 = vrot.slane %v1289_v63, 5  ;;  %v772_v63 = vrot.slane %v3539_v54, 5  ;;  %1671 = vmatpush.bf16.msra.mxu1 %v3350_v32 }
  0x82   : > { %v1292_v24 = vsel %vm3784_vm2, %v1287_v12, %v1291_v15 }
  0x83   : > { %v1369_v46 = vunpack.c.l.b16 %v1292_v24  ;;  %2231 = vmatpush.bf16.msra.mxu3 %v3374_v17 }
  0x86   : > { %688 = vmatmul.bf16.gmra.mxu1 %v3297_v44  ;;  %901 = vmatmul.bf16.gmra.mxu2 %v4150_v29  ;;  %v4229_v29 = vld [vmem:[%s3744_s28 + $0x48] sm:$0xf]  ;;  %v3330_v44 = vld [vmem:[%s3744_s28 + $0x3c] sm:$0xff] }
  0x87   : > { %v1270_v6 = vshrl.u32 %v4229_v29, 16  ;;  %v1273_v51 = vshll.u32 %v4229_v29, 16 }
  0x88   : > { %1107 = vmatmul.bf16.gmra.mxu3 %v3329_v48  ;;  %v1367_v48 = vunpack.c.l.b16 %v1268_v59  ;;  %v3537_v59 = vld [vmem:[%s3744_s28 + $0x4c] sm:$0xf] }
  0x89   : > { %v1272_v8 = vrot.slane %v1270_v6, 4  ;;  %v1275_v38 = vrot.slane %v1273_v51, 5  ;;  %v1307_v6 = vshrl.u32 %v4277_v11, 16  ;;  %v3299_v51 = vld [vmem:[%s3744_s28 + $0x3c] sm:$0xff] }
  0x8a   : > { %v1378_v62 = vpack.c.b16 %v1367_v48, %v1366_v45  ;;  %v3538_v48 = vld [vmem:[%s3744_s28 + $0x48] sm:$0xf] }
  0x8b   : > { %v1276_v53 = vor.u32 %v1275_v38, %v1272_v8  ;;  %v1296_v8 = vrot.slane %v1294_v27, 4  ;;  %v1299_v38 = vrot.slane %v1297_v28, 5  ;;  %v1309_v41 = vrot.slane %v1307_v6, 4 }
  0x8c   : > { %1461 = vmatmul.bf16.gmra.mxu0 %v1377_v13  ;;  %v2816_v50 = vrot.slane %v3538_v48, 9  ;;  %v1318_v27 = vshrl.u32 %v4313_v56, 16  ;;  %v1321_v28 = vshll.u32 %v4313_v56, 16  ;;  %v1331_v6 = vshrl.u32 %v4316_v19, 16  ;;  %v4335_v48 = vld [vmem:[%s3744_s28 + $0x68] sm:$0x1] }
  0x8d   : > { %v1277_v13 = vrot.slane %v1276_v53, 4  ;;  %4775 = vst [vmem:[#allocation5_spill] sm:$0xff] %v4335_v48 }
  0x8f   : > { %v1282_v5 = vsel %vm3784_vm2, %v1277_v13, %v1281_v25  ;;  %v1305_v25 = vrot.slane %v1303_v4, 5  ;;  %v1327_v4 = vshll.u32 %v4316_v19, 16 }
  0x90   : > { %v1368_v42 = vunpack.c.l.b16 %v1282_v5 }
  0x91   : > { %v1310_v3 = vor.u32 %v1309_v41, %v1305_v25  ;;  %v1329_v41 = vrot.slane %v1327_v4, 5 }
  0x92   : > { %v1379_v45 = vpack.c.b16 %v1369_v46, %v1368_v42 }
  0x93   : > { %v1311_v15 = vrot.slane %v1310_v3, 4  ;;  %v779_v3 = vrot.slane %v3905_v22, 5 }
  0x96   : > { %693 = vmatmul.bf16.gmra.mxu1 %v3298_v37  ;;  %906 = vmatmul.bf16.gmra.mxu2 %v818_v36  ;;  %v769_v36 = vrot.slane %v3537_v59, 5  ;;  %v3331_v37 = vld [vmem:[%s3744_s28 + $0x48] sm:$0xff]  ;;  %v3332_v59 = vld [vmem:[%s3744_s28 + $0x54] sm:$0xff] }
  0x98   : > { %1112 = vmatmul.bf16.gmra.mxu3 %v3330_v44  ;;  %v4294_v44 = vld [vmem:[%s3744_s28 + $0x5c] sm:$0x1]  ;;  %v771_v53 = vrot.slane %v769_v36, 4  ;;  %v770_v47 = vsel %vm4013_vm5, %v2816_v50, %v769_v36 }
  0x99   : > { %v1313_v9 = vshll.u32 %v4294_v44, 16  ;;  %v810_v20 = vunpack.c.l.b16 %v770_v47  ;;  %v1337_v47 = vshll.u32 %v4335_v48, 16 }
  0x9a   : > { %v773_v13 = vsel %vm4013_vm5, %v771_v53, %v772_v63  ;;  %v4340_v53 = vld [vmem:[%s3744_s28 + $0x18] sm:$0xf]  ;;  %v2817_v63 = vrot.slane %v3876_v0, 9 }
  0x9b   : > { %v1315_v16 = vrot.slane %v1313_v9, 5  ;;  %v811_v5 = vunpack.c.l.b16 %v773_v13 }
  0x9c   : > { %1466 = vmatmul.bf16.gmra.mxu0 %v1378_v62  ;;  %v1300_v62 = vor.u32 %v1299_v38, %v1296_v8  ;;  %v776_v8 = vrot.slane %v3898_v26, 5  ;;  %v1320_v38 = vrot.slane %v1318_v27, 4  ;;  %v4345_v26 = vld [vmem:[%s3744_s28 + $0x1c] sm:$0xf] }
  0x9d   : > { %v1316_v7 = vsel %vm3784_vm2, %v1311_v15, %v1315_v16  ;;  %v820_v42 = vpack.c.b16 %v811_v5, %v810_v20  ;;  %v1939_v15 = vshll.u32 %v4340_v53, 16  ;;  %v1945_v17 = vshll.u32 %v4345_v26, 16 }
  0x9e   : > { %v1301_v12 = vrot.slane %v1300_v62, 4  ;;  %v778_v62 = vrot.slane %v776_v8, 4  ;;  %v1949_v0 = vshrl.u32 %v4345_v26, 16  ;;  %v777_v32 = vsel %vm4013_vm5, %v2817_v63, %v776_v8 }
  0xa0   : > { %v1306_v24 = vsel %vm3784_vm2, %v1301_v12, %v1305_v25  ;;  %v1323_v25 = vrot.slane %v1321_v28, 5  ;;  %v1936_v12 = vshrl.u32 %v4340_v53, 16  ;;  %v780_v20 = vsel %vm4013_vm5, %v778_v62, %v779_v3 }
  0xa1   : > { %v1370_v36 = vunpack.c.l.b16 %v1306_v24  ;;  %v1941_v28 = vrot.slane %v1939_v15, 5  ;;  %v3020_v15 = vrot.slane %v3970_v39, 9 }
  0xa2   : > { %v1324_v9 = vor.u32 %v1323_v25, %v1320_v38  ;;  %v1938_v27 = vrot.slane %v1936_v12, 4  ;;  %v1513_v38 = vrot.slane %v3973_v40, 5  ;;  %v1516_v12 = vrot.slane %v3996_v2, 5 }
  0xa4   : > { %v1325_v5 = vrot.slane %v1324_v9, 4  ;;  %v1942_v25 = vor.u32 %v1941_v28, %v1938_v27  ;;  %v4387_v27 = vld [vmem:[%s3744_s28 + $0x28] sm:$0xf]  ;;  %v1514_v39 = vsel %vm4013_vm5, %v3020_v15, %v1513_v38 }
  0xa6   : > { %698 = vmatmul.bf16.gmra.mxu1 %v3299_v51  ;;  %911 = vmatmul.bf16.gmra.mxu2 %v819_v52  ;;  %v3382_v51 = vld [vmem:[%s4765_s1 + $0x200] sm:$0xff]  ;;  %v3300_v52 = vld [vmem:[%s3744_s28 + $0x48] sm:$0xff]  ;;  %v1943_v40 = vrot.slane %v1942_v25, 4 }
  0xa7   : > { %2457 = vmatpush.bf16.msra.mxu0 %v3382_v51  ;;  %v813_v51 = vunpack.c.l.b16 %v780_v20  ;;  %v2299_v20 = vrot.slane %v4345_v26, 5 }
  0xa8   : > { %1117 = vmatmul.bf16.gmra.mxu3 %v3331_v37  ;;  %v1371_v37 = vunpack.c.l.b16 %v1316_v7  ;;  %v1339_v7 = vrot.slane %v1337_v47, 5 }
  0xaa   : > { %v1380_v54 = vpack.c.b16 %v1371_v37, %v1370_v36  ;;  %v1330_v36 = vsel %vm3784_vm2, %v1325_v5, %v1329_v41 }
  0xac   : > { %1471 = vmatmul.bf16.gmra.mxu0 %v1379_v45  ;;  %v1333_v45 = vrot.slane %v1331_v6, 4  ;;  %v812_v6 = vunpack.c.l.b16 %v777_v32 }
  0xae   : > { %v1334_v10 = vor.u32 %v1333_v45, %v1329_v41  ;;  %v821_v63 = vpack.c.b16 %v813_v51, %v812_v6  ;;  %v1372_v41 = vunpack.c.l.b16 %v1330_v36  ;;  %v2301_v36 = vrot.slane %v2299_v20, 4 }
  0xb0   : > { %v1335_v24 = vrot.slane %v1334_v10, 4  ;;  %v3333_v10 = vld [vmem:[%s3744_s28 + $0x60] sm:$0xff] }
  0xb2   : > { %v1340_v37 = vsel %vm3784_vm2, %v1335_v24, %v1339_v7  ;;  %v4384_v7 = vld [vmem:[%s3744_s28 + $0x24] sm:$0xf] }
  0xb3   : > { %v4330_v46 = vpop.f32.mrf.mxu1  ;;  %v1373_v47 = vunpack.c.l.b16 %v1340_v37 }
  0xb5   : > { %v1381_v5 = vpack.c.b16 %v1373_v47, %v1372_v41 }
  0xb6   : > { %703 = vmatmul.bf16.gmra.mxu1 %v3300_v52  ;;  %916 = vmatmul.bf16.gmra.mxu2 %v820_v42  ;;  %v1947_v52 = vrot.slane %v1945_v17, 5  ;;  %v1951_v42 = vrot.slane %v1949_v0, 4  ;;  %v1515_v17 = vrot.slane %v1513_v38, 4  ;;  %v1960_v38 = vshrl.u32 %v4384_v7, 16 }
  0xb7   : > { %v4337_v50 = vpop.f32.mrf.mxu0 }
  0xb8   : > { %1122 = vmatmul.bf16.gmra.mxu3 %v3332_v59  ;;  %v3080_v59 = vld [vmem:[%s3744_s28 + $0x20] sm:$0x1]  ;;  %v1952_v62 = vor.u32 %v1951_v42, %v1947_v52  ;;  %v1517_v2 = vsel %vm4013_vm5, %v1515_v17, %v1516_v12  ;;  %v1948_v6 = vsel %vm3784_vm2, %v1943_v40, %v1947_v52  ;;  %v3230_v42 = vrot.slane %v4340_v53, 9 }
  0xb9   : > { %v4348_v13 = vpop.f32.mrf.mxu2  ;;  %v1955_v3 = vshll.u32 %v3080_v59, 16  ;;  %v2302_v37 = vrot.slane %v3080_v59, 5  ;;  %v1973_v52 = vshrl.u32 %v4387_v27, 16  ;;  %v1962_v47 = vrot.slane %v1960_v38, 4 }
  0xba   : > { %v1953_v0 = vrot.slane %v1952_v62, 4  ;;  %v1584_v62 = vunpack.c.l.b16 %v1514_v39  ;;  %v2300_v53 = vsel %vm4013_vm5, %v3230_v42, %v2299_v20 }
  0xbb   : > { %v4352_v16 = vpop.f32.mrf.mxu3  ;;  %v4356_v22 = vpop.f32.mrf.mxu1  ;;  %v1957_v32 = vrot.slane %v1955_v3, 5  ;;  %v1585_v3 = vunpack.c.l.b16 %v1517_v2  ;;  %v2303_v59 = vsel %vm4013_vm5, %v2301_v36, %v2302_v37  ;;  %v1975_v17 = vrot.slane %v1973_v52, 4  ;;  %v3358_v2 = vld [vmem:[%s3744_s28 + $0x18] sm:$0xff] }
  0xbc   : > { %4776 = vst [vmem:[#allocation6_spill] sm:$0xff] %v4352_v16  ;;  %1476 = vmatmul.bf16.gmra.mxu0 %v1380_v54  ;;  %v3301_v54 = vld [vmem:[%s3744_s28 + $0x54] sm:$0xff]  ;;  %v2371_v20 = vunpack.c.l.b16 %v2303_v59 }
  0xbd   : > { %v1958_v51 = vsel %vm3784_vm2, %v1953_v0, %v1957_v32  ;;  %v3083_v0 = vld [vmem:[%s3744_s28 + $0x2c] sm:$0x1]  ;;  %v1600_v39 = vpack.c.b16 %v1585_v3, %v1584_v62  ;;  %v4424_v3 = vld [vmem:[%s3744_s28 + $0x30] sm:$0xf] }
  0xbe   : > { %v2145_v41 = vunpack.c.l.b16 %v1958_v51  ;;  %v1520_v51 = vrot.slane %v4039_v34, 5  ;;  %v1523_v34 = vrot.slane %v4090_v30, 5 }
  0xbf   : > { %v4362_v4 = vpop.f32.mrf.mxu0 }
  0xc0   : > { %v1522_v62 = vrot.slane %v1520_v51, 4 }
  0xc1   : > { %v4369_v8 = vpop.f32.mrf.mxu2 }
  0xc3   : > { %v4372_v45 = vpop.f32.mrf.mxu3  ;;  %v4375_v9 = vpop.f32.mrf.mxu1 }
  0xc4   : > { %4777 = vst [vmem:[#allocation7_spill] sm:$0xff] %v4372_v45 }
  0xc6   : > { %708 = vmatmul.bf16.gmra.mxu1 %v3301_v54  ;;  %921 = vmatmul.bf16.gmra.mxu2 %v821_v63  ;;  %v1963_v54 = vshll.u32 %v4384_v7, 16  ;;  %v1969_v63 = vshll.u32 %v4387_v27, 16 }
  0xc8   : > { %1127 = vmatmul.bf16.gmra.mxu3 %v3333_v10  ;;  %v2144_v10 = vunpack.c.l.b16 %v1948_v6  ;;  %v1965_v12 = vrot.slane %v1963_v54, 5  ;;  %v1971_v15 = vrot.slane %v1969_v63, 5  ;;  %v2370_v6 = vunpack.c.l.b16 %v2300_v53 }
  0xc9   : > { %v4381_v24 = vpop.f32.mrf.mxu0  ;;  %v4389_v28 = vpop.f32.mrf.mxu2  ;;  %v1979_v54 = vshll.u32 %v3083_v0, 16 }
  0xca   : > { %v2160_v36 = vpack.c.b16 %v2145_v41, %v2144_v10  ;;  %v1966_v37 = vor.u32 %v1965_v12, %v1962_v47  ;;  %v1976_v38 = vor.u32 %v1975_v17, %v1971_v15  ;;  %v2386_v52 = vpack.c.b16 %v2371_v20, %v2370_v6 }
  0xcb   : > { %v4397_v26 = vpop.f32.mrf.mxu3  ;;  %v4402_v25 = vpop.f32.mrf.mxu1  ;;  %v1981_v41 = vrot.slane %v1979_v54, 5  ;;  %v2306_v47 = vrot.slane %v4387_v27, 5  ;;  %v1984_v12 = vshrl.u32 %v4424_v3, 16  ;;  %v1987_v17 = vshll.u32 %v4424_v3, 16 }
  0xcc   : > { %4778 = vst [vmem:[#allocation8_spill] sm:$0xff] %v4397_v26  ;;  %1481 = vmatmul.bf16.gmra.mxu0 %v1381_v5  ;;  %v4427_v26 = vld [vmem:[%s3744_s28 + $0x34] sm:$0xf]  ;;  %v1967_v53 = vrot.slane %v1966_v37, 4  ;;  %v1977_v10 = vrot.slane %v1976_v38, 4  ;;  %v1524_v27 = vsel %vm4013_vm5, %v1522_v62, %v1523_v34  ;;  %v3231_v37 = vrot.slane %v4384_v7, 9 }
  0xcd   : > { %v1587_v48 = vunpack.c.l.b16 %v1524_v27  ;;  %v3086_v62 = vld [vmem:[%s3744_s28 + $0x38] sm:$0x1] }
  0xce   : > { %v2307_v7 = vsel %vm4013_vm5, %v3231_v37, %v2306_v47  ;;  %v3022_v37 = vrot.slane %v4114_v55, 9 }
  0xcf   : > { %v2372_v27 = vunpack.c.l.b16 %v2307_v7 }
  0xd1   : > { %v4412_v40 = vpop.f32.mrf.mxu0  ;;  %v4415_v32 = vpop.f32.mrf.mxu2 }
  0xd3   : > { %v4417_v5 = vpop.f32.mrf.mxu3  ;;  %v674_v42 = vpop.f32.mrf.mxu1 }
  0xd4   : > { %4779 = vst [vmem:[#allocation9_spill] sm:$0xff] %v4417_v5  ;;  %v675_v63 = vadd.f32 %v674_v42, %v4337_v50  ;;  %v3021_v5 = vrot.slane %v4036_v43, 9  ;;  %v1993_v43 = vshll.u32 %v4427_v26, 16  ;;  %v1972_v42 = vsel %vm3784_vm2, %v1967_v53, %v1971_v15 }
  0xd5   : > { %v2146_v15 = vunpack.c.l.b16 %v1972_v42 }
  0xd6   : > { %1672 = vmatmul.bf16.vlgmr.msra.gmra.mxu1 %v1600_v39  ;;  %1878 = vmatmul.bf16.vlgmr.msra.gmra.mxu2 %v3358_v2  ;;  %v1997_v39 = vshrl.u32 %v4427_v26, 16  ;;  %v1521_v30 = vsel %vm4013_vm5, %v3021_v5, %v1520_v51  ;;  %v1986_v5 = vrot.slane %v1984_v12, 4  ;;  %v1989_v51 = vrot.slane %v1987_v17, 5 }
  0xd7   : > { %v1586_v16 = vunpack.c.l.b16 %v1521_v30 }
  0xd8   : > { %2232 = vmatmul.bf16.vlgmr.msra.gmra.mxu3 %v2160_v36  ;;  %v1982_v36 = vsel %vm3784_vm2, %v1977_v10, %v1981_v41  ;;  %v1999_v45 = vrot.slane %v1997_v39, 4  ;;  %v1990_v12 = vor.u32 %v1989_v51, %v1986_v5  ;;  %v4461_v51 = vld [vmem:[%s3744_s28 + $0x3c] sm:$0xf] }
  0xd9   : > { %v1447_v59 = vpop.f32.mrf.mxu0  ;;  %v887_v50 = vpop.f32.mrf.mxu2  ;;  %v2147_v53 = vunpack.c.l.b16 %v1982_v36 }
  0xda   : > { %v927_v2 = vadd.f32 %v887_v50, %v675_v63  ;;  %v2308_v63 = vrot.slane %v2306_v47, 4  ;;  %v2309_v50 = vrot.slane %v3083_v0, 5  ;;  %v1527_v0 = vrot.slane %v4117_v57, 5 }
  0xdb   : > { %v1093_v6 = vpop.f32.mrf.mxu3  ;;  %v676_v20 = vpop.f32.mrf.mxu1 }
  0xdc   : > { %2458 = vmatmul.bf16.vlgmr.msra.gmra.mxu0 %v2386_v52  ;;  %v1133_v38 = vadd.f32 %v1093_v6, %v927_v2  ;;  %v677_v54 = vadd.f32 %v676_v20, %v4362_v4  ;;  %v1995_v52 = vrot.slane %v1993_v43, 5  ;;  %v2310_v4 = vsel %vm4013_vm5, %v2308_v63, %v2309_v50 }
  0xdd   : > { %v2003_v43 = vshll.u32 %v3086_v62, 16  ;;  %v1601_v6 = vpack.c.b16 %v1587_v48, %v1586_v16  ;;  %v2161_v20 = vpack.c.b16 %v2147_v53, %v2146_v15  ;;  %v2373_v42 = vunpack.c.l.b16 %v2310_v4 }
  0xde   : > { %v4446_v34 = vadd.f32 %v1447_v59, %v1133_v38  ;;  %v2000_v17 = vor.u32 %v1999_v45, %v1995_v52  ;;  %v3359_v59 = vld [vmem:[%s3744_s28 + $0x24] sm:$0xff]  ;;  %v1529_v57 = vrot.slane %v1527_v0, 4  ;;  %v1530_v38 = vrot.slane %v4143_v33, 5 }
  0xdf   : > { %v1991_v45 = vrot.slane %v1990_v12, 4  ;;  %v2313_v48 = vrot.slane %v4427_v26, 5  ;;  %v2387_v16 = vpack.c.b16 %v2373_v42, %v2372_v27  ;;  %v1528_v33 = vsel %vm4013_vm5, %v3022_v37, %v1527_v0 }
  0xe0   : > { %v2001_v63 = vrot.slane %v2000_v17, 4  ;;  %v1531_v15 = vsel %vm4013_vm5, %v1529_v57, %v1530_v38  ;;  %v3232_v4 = vrot.slane %v4424_v3, 9  ;;  %v2316_v12 = vrot.slane %v3086_v62, 5 }
  0xe1   : > { %v1449_v10 = vpop.f32.mrf.mxu0  ;;  %v889_v41 = vpop.f32.mrf.mxu2  ;;  %v1996_v53 = vsel %vm3784_vm2, %v1991_v45, %v1995_v52  ;;  %v2011_v0 = vshll.u32 %v4461_v51, 16  ;;  %v4487_v45 = vld [vmem:[%s3744_s28 + $0x44] sm:$0x1] }
  0xe2   : > { %v928_v39 = vadd.f32 %v889_v41, %v677_v54  ;;  %v2005_v54 = vrot.slane %v2003_v43, 5  ;;  %v2315_v41 = vrot.slane %v2313_v48, 4  ;;  %v2008_v43 = vshrl.u32 %v4461_v51, 16 }
  0xe3   : > { %v1095_v2 = vpop.f32.mrf.mxu3  ;;  %v679_v30 = vpop.f32.mrf.mxu1  ;;  %v2148_v3 = vunpack.c.l.b16 %v1996_v53  ;;  %v2314_v62 = vsel %vm4013_vm5, %v3232_v4, %v2313_v48 }
  0xe4   : > { %v1134_v36 = vadd.f32 %v1095_v2, %v928_v39  ;;  %v680_v47 = vadd.f32 %v679_v30, %v4381_v24  ;;  %v4464_v24 = vld [vmem:[%s3744_s28 + $0x40] sm:$0xf]  ;;  %v2006_v26 = vsel %vm3784_vm2, %v2001_v63, %v2005_v54  ;;  %v1589_v30 = vunpack.c.l.b16 %v1531_v15 }
  0xe5   : > { %v2017_v39 = vshll.u32 %v4464_v24, 16  ;;  %v2021_v52 = vshrl.u32 %v4464_v24, 16  ;;  %v2317_v27 = vsel %vm4013_vm5, %v2315_v41, %v2316_v12  ;;  %v1534_v15 = vrot.slane %v4168_v61, 5  ;;  %v4499_v61 = vld [vmem:[%s3744_s28 + $0x4c] sm:$0xf] }
  0xe6   : > { %1677 = vmatmul.bf16.gmra.mxu1 %v1601_v6  ;;  %1883 = vmatmul.bf16.gmra.mxu2 %v3359_v59  ;;  %v4458_v50 = vadd.f32 %v1449_v10, %v1134_v36  ;;  %v1588_v59 = vunpack.c.l.b16 %v1528_v33  ;;  %v2010_v36 = vrot.slane %v2008_v43, 4  ;;  %v2374_v33 = vunpack.c.l.b16 %v2314_v62 }
  0xe7   : > { %v2019_v37 = vrot.slane %v2017_v39, 5  ;;  %v2023_v57 = vrot.slane %v2021_v52, 4  ;;  %v2375_v48 = vunpack.c.l.b16 %v2317_v27  ;;  %v3023_v12 = vrot.slane %v4165_v60, 9  ;;  %v4496_v39 = vld [vmem:[%s3744_s28 + $0x48] sm:$0xf] }
  0xe8   : > { %2237 = vmatmul.bf16.gmra.mxu3 %v2161_v20  ;;  %v2149_v20 = vunpack.c.l.b16 %v2006_v26  ;;  %v1602_v63 = vpack.c.b16 %v1589_v30, %v1588_v59  ;;  %v1536_v43 = vrot.slane %v1534_v15, 4  ;;  %v2045_v62 = vshrl.u32 %v4499_v61, 16 }
  0xe9   : > { %v1452_v5 = vpop.f32.mrf.mxu0  ;;  %v892_v55 = vpop.f32.mrf.mxu2 }
  0xea   : > { %v929_v10 = vadd.f32 %v892_v55, %v680_v47  ;;  %v2013_v47 = vrot.slane %v2011_v0, 5  ;;  %v3360_v55 = vld [vmem:[%s3744_s28 + $0x30] sm:$0xff]  ;;  %v2162_v53 = vpack.c.b16 %v2149_v20, %v2148_v3  ;;  %v1537_v0 = vrot.slane %v4181_v49, 5 }
  0xeb   : > { %v1098_v7 = vpop.f32.mrf.mxu3  ;;  %v681_v17 = vpop.f32.mrf.mxu1  ;;  %v2032_v3 = vshrl.u32 %v4496_v39, 16  ;;  %v2035_v20 = vshll.u32 %v4496_v39, 16  ;;  %v2041_v49 = vshll.u32 %v4499_v61, 16 }
  0xec   : > { %2463 = vmatmul.bf16.gmra.mxu0 %v2387_v16  ;;  %v1135_v2 = vadd.f32 %v1098_v7, %v929_v10  ;;  %v682_v6 = vadd.f32 %v681_v17, %v4412_v40  ;;  %v2014_v26 = vor.u32 %v2013_v47, %v2010_v36  ;;  %v2024_v10 = vor.u32 %v2023_v57, %v2019_v37 }
  0xed   : > { %v2027_v7 = vshll.u32 %v4487_v45, 16  ;;  %v2388_v17 = vpack.c.b16 %v2375_v48, %v2374_v33  ;;  %v1535_v47 = vsel %vm4013_vm5, %v3023_v12, %v1534_v15  ;;  %v2323_v33 = vrot.slane %v4487_v45, 5 }
  0xee   : > { %v4484_v42 = vadd.f32 %v1452_v5, %v1135_v2  ;;  %v2015_v52 = vrot.slane %v2014_v26, 4  ;;  %v2025_v2 = vrot.slane %v2024_v10, 4  ;;  %v2034_v48 = vrot.slane %v2032_v3, 4 }
  0xef   : > { %v2037_v15 = vrot.slane %v2035_v20, 5  ;;  %v1590_v26 = vunpack.c.l.b16 %v1535_v47  ;;  %v1541_v45 = vrot.slane %v4201_v21, 5  ;;  %v1544_v47 = vrot.slane %v4215_v1, 5 }
  0xf1   : > { %v1454_v38 = vpop.f32.mrf.mxu0  ;;  %v894_v40 = vpop.f32.mrf.mxu2  ;;  %v1543_v21 = vrot.slane %v1541_v45, 4 }
  0xf2   : > { %v930_v54 = vadd.f32 %v894_v40, %v682_v6  ;;  %v2029_v6 = vrot.slane %v2027_v7, 5  ;;  %v3092_v7 = vld [vmem:[%s3744_s28 + $0x50] sm:$0x1] }
  0xf3   : > { %v1100_v16 = vpop.f32.mrf.mxu3  ;;  %v684_v5 = vpop.f32.mrf.mxu1 }
  0xf4   : > { %v1136_v4 = vadd.f32 %v1100_v16, %v930_v54  ;;  %v685_v41 = vadd.f32 %v684_v5, %v4330_v46  ;;  %v2320_v46 = vrot.slane %v4464_v24, 5  ;;  %v1538_v24 = vsel %vm4013_vm5, %v1536_v43, %v1537_v0 }
  0xf5   : > { %v2030_v40 = vsel %vm3784_vm2, %v2025_v2, %v2029_v6  ;;  %v2043_v5 = vrot.slane %v2041_v49, 5  ;;  %v1591_v10 = vunpack.c.l.b16 %v1538_v24  ;;  %v2038_v43 = vor.u32 %v2037_v15, %v2034_v48 }
  0xf6   : > { %1682 = vmatmul.bf16.gmra.mxu1 %v1602_v63  ;;  %1888 = vmatmul.bf16.gmra.mxu2 %v3360_v55  ;;  %v4501_v59 = vadd.f32 %v1454_v38, %v1136_v4  ;;  %v2020_v38 = vsel %vm3784_vm2, %v2015_v52, %v2019_v37  ;;  %v3233_v63 = vrot.slane %v4461_v51, 9  ;;  %v2322_v55 = vrot.slane %v2320_v46, 4 }
  0xf7   : > { %v2150_v4 = vunpack.c.l.b16 %v2020_v38  ;;  %v2051_v52 = vshll.u32 %v3092_v7, 16 }
  0xf8   : > { %2242 = vmatmul.bf16.gmra.mxu3 %v2162_v53  ;;  %v2047_v53 = vrot.slane %v2045_v62, 4  ;;  %v2321_v51 = vsel %vm4013_vm5, %v3233_v63, %v2320_v46 }
  0xf9   : > { %v1457_v30 = vpop.f32.mrf.mxu0  ;;  %v897_v60 = vpop.f32.mrf.mxu2  ;;  %v2376_v49 = vunpack.c.l.b16 %v2321_v51  ;;  %v2053_v38 = vrot.slane %v2051_v52, 5 }
  0xfa   : > { %v931_v27 = vadd.f32 %v897_v60, %v685_v41  ;;  %v2151_v41 = vunpack.c.l.b16 %v2030_v40  ;;  %v2048_v0 = vor.u32 %v2047_v53, %v2043_v5  ;;  %v1603_v60 = vpack.c.b16 %v1591_v10, %v1590_v26 }
  0xfb   : > { %v1103_v36 = vpop.f32.mrf.mxu3  ;;  %v686_v57 = vpop.f32.mrf.mxu1  ;;  %v2327_v40 = vrot.slane %v4499_v61, 5  ;;  %v3234_v26 = vrot.slane %v4496_v39, 9 }
  0xfc   : > { %2468 = vmatmul.bf16.gmra.mxu0 %v2388_v17  ;;  %v1137_v54 = vadd.f32 %v1103_v36, %v931_v27  ;;  %v687_v16 = vadd.f32 %v686_v57, %v4356_v22  ;;  %v2324_v22 = vsel %vm4013_vm5, %v2322_v55, %v2323_v33  ;;  %v2163_v20 = vpack.c.b16 %v2151_v41, %v2150_v4  ;;  %v4535_v55 = vld [vmem:[%s3744_s28 + $0x54] sm:$0xf] }
  0xfd   : > { %v2377_v62 = vunpack.c.l.b16 %v2324_v22  ;;  %v3024_v36 = vrot.slane %v4198_v35, 9  ;;  %v2039_v57 = vrot.slane %v2038_v43, 4  ;;  %v2049_v24 = vrot.slane %v2048_v0, 4 }
  0xfe   : > { %v4520_v37 = vadd.f32 %v1457_v30, %v1137_v54  ;;  %v3361_v30 = vld [vmem:[%s3744_s28 + $0x3c] sm:$0xff]  ;;  %v1545_v33 = vsel %vm4013_vm5, %v1543_v21, %v1544_v47  ;;  %v2329_v10 = vrot.slane %v2327_v40, 4  ;;  %v2330_v4 = vrot.slane %v3092_v7, 5  ;;  %v3362_v21 = vld [vmem:[%s3744_s28 + $0x48] sm:$0xff] }
  0xff   : > { %v2389_v63 = vpack.c.b16 %v2377_v62, %v2376_v49  ;;  %v1542_v1 = vsel %vm4013_vm5, %v3024_v36, %v1541_v45  ;;  %v2044_v48 = vsel %vm3784_vm2, %v2039_v57, %v2043_v5  ;;  %v2054_v61 = vsel %vm3784_vm2, %v2049_v24, %v2053_v38  ;;  %v4561_v62 = vld [vmem:[%s3744_s28 + $0x5c] sm:$0x1] }
 0x100   : > { %v2059_v51 = vshll.u32 %v4535_v55, 16  ;;  %v1592_v43 = vunpack.c.l.b16 %v1542_v1  ;;  %v1593_v0 = vunpack.c.l.b16 %v1545_v33  ;;  %v2152_v39 = vunpack.c.l.b16 %v2044_v48 }
 0x101   : > { %v1459_v12 = vpop.f32.mrf.mxu0  ;;  %v899_v17 = vpop.f32.mrf.mxu2  ;;  %v2153_v52 = vunpack.c.l.b16 %v2054_v61  ;;  %v2328_v7 = vsel %vm4013_vm5, %v3234_v26, %v2327_v40  ;;  %v1548_v24 = vrot.slane %v4232_v14, 5  ;;  %v3025_v33 = vrot.slane %v4229_v29, 9  ;;  %v4572_v26 = vld [vmem:[%s3744_s28 + $0x64] sm:$0xf] }
 0x102   : > { %v932_v2 = vadd.f32 %v899_v17, %v687_v16  ;;  %v2378_v47 = vunpack.c.l.b16 %v2328_v7 }
 0x103   : > { %v1105_v6 = vpop.f32.mrf.mxu3  ;;  %v689_v3 = vpop.f32.mrf.mxu1  ;;  %v2164_v40 = vpack.c.b16 %v2153_v52, %v2152_v39  ;;  %v1550_v61 = vrot.slane %v1548_v24, 4 }
 0x104   : > { %v1138_v27 = vadd.f32 %v1105_v6, %v932_v2  ;;  %v690_v46 = vadd.f32 %v689_v3, %v4375_v9  ;;  %v4538_v9 = vld [vmem:[%s3744_s28 + $0x58] sm:$0xf]  ;;  %v2331_v2 = vsel %vm4013_vm5, %v2329_v10, %v2330_v4 }
 0x105   : > { %v2065_v22 = vshll.u32 %v4538_v9, 16  ;;  %v2069_v5 = vshrl.u32 %v4538_v9, 16  ;;  %v2379_v57 = vunpack.c.l.b16 %v2331_v2  ;;  %v2334_v29 = vrot.slane %v4538_v9, 5 }
 0x106   : > { %1687 = vmatmul.bf16.gmra.mxu1 %v1603_v60  ;;  %1893 = vmatmul.bf16.gmra.mxu2 %v3361_v30  ;;  %v4532_v54 = vadd.f32 %v1459_v12, %v1138_v27  ;;  %v2056_v12 = vshrl.u32 %v4535_v55, 16  ;;  %v2061_v30 = vrot.slane %v2059_v51, 5  ;;  %v1604_v27 = vpack.c.b16 %v1593_v0, %v1592_v43 }
 0x107   : > { %v2067_v3 = vrot.slane %v2065_v22, 5  ;;  %v2390_v48 = vpack.c.b16 %v2379_v57, %v2378_v47  ;;  %v3098_v47 = vld [vmem:[%s3744_s28 + $0x68] sm:$0x1] }
 0x108   : > { %2247 = vmatmul.bf16.gmra.mxu3 %v2163_v20  ;;  %v2058_v60 = vrot.slane %v2056_v12, 4  ;;  %v2071_v20 = vrot.slane %v2069_v5, 4 }
 0x109   : > { %v1462_v16 = vpop.f32.mrf.mxu0  ;;  %v902_v35 = vpop.f32.mrf.mxu2 }
 0x10a   : > { %v933_v15 = vadd.f32 %v902_v35, %v690_v46  ;;  %v2075_v35 = vshll.u32 %v4561_v62, 16 }
 0x10b   : > { %v1108_v53 = vpop.f32.mrf.mxu3  ;;  %v691_v41 = vpop.f32.mrf.mxu1 }
 0x10c   : > { %2473 = vmatmul.bf16.gmra.mxu0 %v2389_v63  ;;  %v1139_v45 = vadd.f32 %v1108_v53, %v933_v15  ;;  %v692_v17 = vadd.f32 %v691_v41, %v4402_v25  ;;  %v2062_v63 = vor.u32 %v2061_v30, %v2058_v60  ;;  %v1551_v15 = vrot.slane %v4255_v58, 5  ;;  %v4569_v53 = vld [vmem:[%s3744_s28 + $0x60] sm:$0xf] }
 0x10d   : > { %v2077_v4 = vrot.slane %v2075_v35, 5  ;;  %v2080_v5 = vshrl.u32 %v4569_v53, 16  ;;  %v2083_v58 = vshll.u32 %v4569_v53, 16  ;;  %v3235_v60 = vrot.slane %v4535_v55, 9 }
 0x10e   : > { %v4558_v6 = vadd.f32 %v1462_v16, %v1139_v45  ;;  %v2072_v16 = vor.u32 %v2071_v20, %v2067_v3  ;;  %v2063_v14 = vrot.slane %v2062_v63, 4  ;;  %v2089_v45 = vshll.u32 %v4572_v26, 16 }
 0x10f   : > { %v1552_v9 = vsel %vm4013_vm5, %v1550_v61, %v1551_v15  ;;  %v2336_v30 = vrot.slane %v2334_v29, 4  ;;  %v2337_v20 = vrot.slane %v4561_v62, 5  ;;  %v2335_v55 = vsel %vm4013_vm5, %v3235_v60, %v2334_v29 }
 0x110   : > { %v2073_v10 = vrot.slane %v2072_v16, 4  ;;  %v2068_v52 = vsel %vm3784_vm2, %v2063_v14, %v2067_v3  ;;  %v1555_v63 = vrot.slane %v4277_v11, 5  ;;  %v3363_v14 = vld [vmem:[%s3744_s28 + $0x54] sm:$0xff]  ;;  %v3026_v29 = vrot.slane %v4274_v18, 9  ;;  %v4612_v18 = vld [vmem:[%s3744_s28 + $0x70] sm:$0xf] }
 0x111   : > { %v1464_v49 = vpop.f32.mrf.mxu0  ;;  %v904_v25 = vpop.f32.mrf.mxu2  ;;  %v2154_v3 = vunpack.c.l.b16 %v2068_v52  ;;  %v2338_v62 = vsel %vm4013_vm5, %v2336_v30, %v2337_v20  ;;  %v1558_v11 = vrot.slane %v4294_v44, 5  ;;  %v3236_v30 = vrot.slane %v4569_v53, 9 }
 0x112   : > { %v934_v46 = vadd.f32 %v904_v25, %v692_v17  ;;  %v2093_v17 = vshrl.u32 %v4572_v26, 16  ;;  %v2078_v7 = vsel %vm3784_vm2, %v2073_v10, %v2077_v4  ;;  %v2085_v25 = vrot.slane %v2083_v58, 5 }
 0x113   : > { %v1110_v36 = vpop.f32.mrf.mxu3  ;;  %v694_v38 = vpop.f32.mrf.mxu1  ;;  %v1556_v44 = vsel %vm4013_vm5, %v3026_v29, %v1555_v63  ;;  %v1562_v29 = vrot.slane %v4316_v19, 5 }
 0x114   : > { %v1140_v1 = vadd.f32 %v1110_v36, %v934_v46  ;;  %v695_v12 = vadd.f32 %v694_v38, %v4348_v13  ;;  %v1549_v13 = vsel %vm4013_vm5, %v3025_v33, %v1548_v24  ;;  %v2095_v46 = vrot.slane %v2093_v17, 4 }
 0x115   : > { %v1594_v36 = vunpack.c.l.b16 %v1549_v13  ;;  %v2155_v24 = vunpack.c.l.b16 %v2078_v7  ;;  %v2099_v33 = vshll.u32 %v3098_v47, 16  ;;  %v2341_v17 = vrot.slane %v4572_v26, 5 }
 0x116   : > { %1692 = vmatmul.bf16.gmra.mxu1 %v1604_v27  ;;  %1898 = vmatmul.bf16.gmra.mxu2 %v3362_v21  ;;  %v4574_v41 = vadd.f32 %v1464_v49, %v1140_v1  ;;  %v2082_v49 = vrot.slane %v2080_v5, 4  ;;  %v2091_v27 = vrot.slane %v2089_v45, 5  ;;  %v1595_v21 = vunpack.c.l.b16 %v1552_v9  ;;  %v4609_v9 = vld [vmem:[%s3744_s28 + $0x6c] sm:$0xf] }
 0x117   : > { %v2165_v4 = vpack.c.b16 %v2155_v24, %v2154_v3  ;;  %v2101_v45 = vrot.slane %v2099_v33, 5  ;;  %v2343_v20 = vrot.slane %v2341_v17, 4  ;;  %v1596_v24 = vunpack.c.l.b16 %v1556_v44 }
 0x118   : > { %2252 = vmatmul.bf16.gmra.mxu3 %v2164_v40  ;;  %v2086_v35 = vor.u32 %v2085_v25, %v2082_v49  ;;  %v2096_v1 = vor.u32 %v2095_v46, %v2091_v27  ;;  %v1605_v15 = vpack.c.b16 %v1595_v21, %v1594_v36  ;;  %v2344_v49 = vrot.slane %v3098_v47, 5 }
 0x119   : > { %v1467_v51 = vpop.f32.mrf.mxu0  ;;  %v907_v22 = vpop.f32.mrf.mxu2  ;;  %v2104_v46 = vshrl.u32 %v4609_v9, 16  ;;  %v2107_v36 = vshll.u32 %v4609_v9, 16  ;;  %v2113_v21 = vshll.u32 %v4612_v18, 16  ;;  %v2342_v53 = vsel %vm4013_vm5, %v3236_v30, %v2341_v17 }
 0x11a   : > { %v935_v43 = vadd.f32 %v907_v22, %v695_v12  ;;  %v2381_v12 = vunpack.c.l.b16 %v2338_v62  ;;  %v1557_v22 = vrot.slane %v1555_v63, 4  ;;  %v2087_v5 = vrot.slane %v2086_v35, 4 }
 0x11b   : > { %v1113_v0 = vpop.f32.mrf.mxu3  ;;  %v696_v39 = vpop.f32.mrf.mxu1  ;;  %v2097_v58 = vrot.slane %v2096_v1, 4  ;;  %v2345_v47 = vsel %vm4013_vm5, %v2343_v20, %v2344_v49  ;;  %v2106_v63 = vrot.slane %v2104_v46, 4  ;;  %v2115_v35 = vrot.slane %v2113_v21, 5 }
 0x11c   : > { %2478 = vmatmul.bf16.gmra.mxu0 %v2390_v48  ;;  %v1141_v2 = vadd.f32 %v1113_v0, %v935_v43  ;;  %v697_v38 = vadd.f32 %v696_v39, %v4369_v8  ;;  %v2380_v8 = vunpack.c.l.b16 %v2335_v55  ;;  %v1559_v7 = vsel %vm4013_vm5, %v1557_v22, %v1558_v11 }
 0x11d   : > { %v2092_v26 = vsel %vm3784_vm2, %v2087_v5, %v2091_v27  ;;  %v2117_v27 = vshrl.u32 %v4612_v18, 16  ;;  %v2348_v30 = vrot.slane %v4612_v18, 5  ;;  %v3237_v18 = vrot.slane %v4609_v9, 9 }
 0x11e   : > { %v4593_v57 = vadd.f32 %v1467_v51, %v1141_v2  ;;  %v2391_v43 = vpack.c.b16 %v2381_v12, %v2380_v8  ;;  %v2102_v2 = vsel %vm3784_vm2, %v2097_v58, %v2101_v45  ;;  %v3364_v8 = vld [vmem:[%s3744_s28 + $0x60] sm:$0xff]  ;;  %v2382_v12 = vunpack.c.l.b16 %v2342_v53 }
 0x11f   : > { %v2157_v55 = vunpack.c.l.b16 %v2102_v2  ;;  %v2119_v1 = vrot.slane %v2117_v27, 4  ;;  %v4781_v2 = vld [vmem:[#allocation6_spill] sm:$0xff] }
 0x121   : > { %v1469_v40 = vpop.f32.mrf.mxu0  ;;  %v909_v16 = vpop.f32.mrf.mxu2  ;;  %v2120_v58 = vor.u32 %v2119_v1, %v2115_v35 }
 0x122   : > { %v936_v48 = vadd.f32 %v909_v16, %v697_v38  ;;  %v1597_v38 = vunpack.c.l.b16 %v1559_v7  ;;  %v2109_v16 = vrot.slane %v2107_v36, 5 }
 0x123   : > { %v1115_v61 = vpop.f32.mrf.mxu3  ;;  %v699_v10 = vpop.f32.mrf.mxu1 }
 0x124   : > { %v1142_v51 = vadd.f32 %v1115_v61, %v936_v48  ;;  %v700_v39 = vadd.f32 %v699_v10, %v4389_v28  ;;  %v3101_v61 = vld [vmem:[%s3744_s28 + $0x74] sm:$0x1]  ;;  %v2110_v5 = vor.u32 %v2109_v16, %v2106_v63 }
 0x125   : > { %v2123_v45 = vshll.u32 %v3101_v61, 16  ;;  %v4782_v16 = vld [vmem:[#allocation7_spill] sm:$0xff] }
 0x126   : > { %1697 = vmatmul.bf16.gmra.mxu1 %v1605_v15  ;;  %1903 = vmatmul.bf16.gmra.mxu2 %v3363_v14  ;;  %v4605_v0 = vadd.f32 %v1469_v40, %v1142_v51  ;;  %v2156_v40 = vunpack.c.l.b16 %v2092_v26  ;;  %v1606_v14 = vpack.c.b16 %v1597_v38, %v1596_v24  ;;  %v2383_v51 = vunpack.c.l.b16 %v2345_v47 }
 0x127   : > { %v2111_v7 = vrot.slane %v2110_v5, 4  ;;  %v2121_v26 = vrot.slane %v2120_v58, 4  ;;  %v2125_v19 = vrot.slane %v2123_v45, 5  ;;  %v2350_v24 = vrot.slane %v2348_v30, 4 }
 0x128   : > { %2257 = vmatmul.bf16.gmra.mxu3 %v2165_v4  ;;  %v2166_v11 = vpack.c.b16 %v2157_v55, %v2156_v40  ;;  %v2351_v38 = vrot.slane %v3101_v61, 5  ;;  %v3365_v61 = vld [vmem:[%s3744_s28 + $0x6c] sm:$0xff]  ;;  %s3556_s28 = scalar_lea.hbm %s3555_s10, 64 }
 0x129   : > { %v1472_v13 = vpop.f32.mrf.mxu0  ;;  %v912_v52 = vpop.f32.mrf.mxu2  ;;  %v2116_v21 = vsel %vm3784_vm2, %v2111_v7, %v2115_v35  ;;  %v2126_v27 = vsel %vm3784_vm2, %v2121_v26, %v2125_v19  ;;  %v2349_v35 = vsel %vm4013_vm5, %v3237_v18, %v2348_v30  ;;  %p3557_p13 = scmp.ne.s32.totalorder %s3555_s10, %s3556_s28  ;;  %p3562_p4 = scmp.lt.s32.totalorder %s3560_s27, %s3556_s28 }
 0x12a   : > { %v937_v60 = vadd.f32 %v912_v52, %v700_v39  ;;  %v1564_v39 = vrot.slane %v1562_v29, 4  ;;  %v4780_v52 = vld [vmem:[#allocation5_spill] sm:$0xff]  ;;  %v2158_v47 = vunpack.c.l.b16 %v2116_v21  ;;  %v2159_v63 = vunpack.c.l.b16 %v2126_v27 }
 0x12b   : > { %v1118_v28 = vpop.f32.mrf.mxu3  ;;  %v701_v25 = vpop.f32.mrf.mxu1  ;;  %v1565_v44 = vrot.slane %v4780_v52, 5  ;;  %v2352_v31 = vsel %vm4013_vm5, %v2350_v24, %v2351_v38  ;;  %v4784_v52 = vld [vmem:[#allocation9_spill] sm:$0xff]  ;;  %p3558_p0 = pnand %p3557_p13, %p3709_p3  ;;  %p3563_p5 = por %p3562_p4, %p3561_p2 }
 0x12c   : > { %2483 = vmatmul.bf16.gmra.mxu0 %v2391_v43  ;;  %v1143_v3 = vadd.f32 %v1118_v28, %v937_v60  ;;  %v702_v33 = vadd.f32 %v701_v25, %v4415_v32  ;;  %v2392_v32 = vpack.c.b16 %v2383_v51, %v2382_v12  ;;  %v3027_v43 = vrot.slane %v4313_v56, 9  ;;  %v4673_v38 = vld [vmem:[%s4766_s2] ss:$0 sm:$0xff] }
 0x12d   : > { %v1566_v36 = vsel %vm4013_vm5, %v1564_v39, %v1565_v44  ;;  %v2385_v12 = vunpack.c.l.b16 %v2352_v31  ;;  %p3559_p1 = pneg %p3558_p0 }
 0x12e   : > { %v4631_v62 = vadd.f32 %v1472_v13, %v1143_v3  ;;  %v1563_v56 = vsel %vm4013_vm5, %v3027_v43, %v1562_v29  ;;  %v1599_v55 = vunpack.c.l.b16 %v1566_v36 }
 0x12f   : > { %v1598_v40 = vunpack.c.l.b16 %v1563_v56  ;;  %p3564_p6 = pnand %p3563_p5, %p3559_p1 }
 0x131   : > { %v1474_v48 = vpop.f32.mrf.mxu0  ;;  %v914_v15 = vpop.f32.mrf.mxu2 }
 0x132   : > { %v938_v10 = vadd.f32 %v914_v15, %v702_v33 }
 0x133   : > { %v1120_v4 = vpop.f32.mrf.mxu3  ;;  %v704_v22 = vpop.f32.mrf.mxu1 }
 0x134   : > { %v1144_v17 = vadd.f32 %v1120_v4, %v938_v10  ;;  %v705_v60 = vadd.f32 %v704_v22, %v4781_v2  ;;  %v2167_v4 = vpack.c.b16 %v2159_v63, %v2158_v47 }
 0x136   : > { %1702 = vmatmul.bf16.gmra.mxu1 %v1606_v14  ;;  %1908 = vmatmul.bf16.gmra.mxu2 %v3364_v8  ;;  %v4638_v13 = vadd.f32 %v1474_v48, %v1144_v17  ;;  %v1607_v14 = vpack.c.b16 %v1599_v55, %v1598_v40  ;;  %v2384_v8 = vunpack.c.l.b16 %v2349_v35 }
 0x138   : > { %2262 = vmatmul.bf16.gmra.mxu3 %v2166_v11  ;;  %v2393_v22 = vpack.c.b16 %v2385_v12, %v2384_v8  ;;  %v4783_v11 = vld [vmem:[#allocation8_spill] sm:$0xff] }
 0x139   : > { %v1477_v28 = vpop.f32.mrf.mxu0  ;;  %v917_v20 = vpop.f32.mrf.mxu2 }
 0x13a   : > { %v939_v49 = vadd.f32 %v917_v20, %v705_v60 }
 0x13b   : > { %v1123_v25 = vpop.f32.mrf.mxu3  ;;  %v706_v46 = vpop.f32.mrf.mxu1 }
 0x13c   : > { %2488 = vmatmul.bf16.gmra.mxu0 %v2392_v32  ;;  %v1145_v3 = vadd.f32 %v1123_v25, %v939_v49  ;;  %v707_v1 = vadd.f32 %v706_v46, %v4782_v16 }
 0x13e   : > { %v4652_v53 = vadd.f32 %v1477_v28, %v1145_v3 }
 0x141   : > { %v1479_v33 = vpop.f32.mrf.mxu0  ;;  %v919_v48 = vpop.f32.mrf.mxu2 }
 0x142   : > { %v940_v9 = vadd.f32 %v919_v48, %v707_v1 }
 0x143   : > { %v1125_v15 = vpop.f32.mrf.mxu3  ;;  %v709_v10 = vpop.f32.mrf.mxu1 }
 0x144   : > { %v1146_v51 = vadd.f32 %v1125_v15, %v940_v9  ;;  %v710_v5 = vadd.f32 %v709_v10, %v4783_v11 }
 0x146   : > { %1707 = vmatmul.bf16.gmra.mxu1 %v1607_v14  ;;  %1913 = vmatmul.bf16.gmra.mxu2 %v3365_v61  ;;  %v4660_v29 = vadd.f32 %v1479_v33, %v1146_v51 }
 0x148   : > { %2267 = vmatmul.bf16.gmra.mxu3 %v2167_v4 }
 0x149   : > { %v1482_v23 = vpop.f32.mrf.mxu0  ;;  %v922_v58 = vpop.f32.mrf.mxu2 }
 0x14a   : > { %v941_v45 = vadd.f32 %v922_v58, %v710_v5 }
 0x14b   : > { %v1128_v17 = vpop.f32.mrf.mxu3  ;;  %v711_v32 = vpop.f32.mrf.mxu1 }
 0x14c   : > { %2493 = vmatmul.bf16.gmra.mxu0 %v2393_v22  ;;  %v1147_v43 = vadd.f32 %v1128_v17, %v941_v45  ;;  %v712_v44 = vadd.f32 %v711_v32, %v4784_v52 }
 0x14e   : > { %v4663_v39 = vadd.f32 %v1482_v23, %v1147_v43 }
 0x151   : > { %v1484_v7 = vpop.f32.mrf.mxu0  ;;  %v924_v26 = vpop.f32.mrf.mxu2 }
 0x152   : > { %v942_v19 = vadd.f32 %v924_v26, %v712_v44 }
 0x153   : > { %v1130_v2 = vpop.f32.mrf.mxu3  ;;  %v1673_v60 = vpop.f32.mrf.mxu1 }
 0x154   : > { %v1148_v28 = vadd.f32 %v1130_v2, %v942_v19  ;;  %v1713_v20 = vadd.f32 %v1673_v60, %v4446_v34 }
 0x156   : > { %v4666_v30 = vadd.f32 %v1484_v7, %v1148_v28 }
 0x159   : > { %v2459_v49 = vpop.f32.mrf.mxu0  ;;  %v1879_v25 = vpop.f32.mrf.mxu2 }
 0x15a   : > { %v1919_v46 = vadd.f32 %v1879_v25, %v1713_v20 }
 0x15b   : > { %v2233_v56 = vpop.f32.mrf.mxu3  ;;  %v1675_v36 = vpop.f32.mrf.mxu1 }
 0x15c   : > { %v2273_v21 = vadd.f32 %v2233_v56, %v1919_v46  ;;  %v1714_v27 = vadd.f32 %v1675_v36, %v4458_v50 }
 0x15e   : > { %v2499_v24 = vadd.f32 %v2459_v49, %v2273_v21 }
 0x160   : > { %v2519_v63 = vadd.f32 %v4673_v38, %v2499_v24 }
 0x161   : > { %v2461_v3 = vpop.f32.mrf.mxu0  ;;  %v1881_v18 = vpop.f32.mrf.mxu2 }
 0x162   : > { %v1920_v40 = vadd.f32 %v1881_v18, %v1714_v27  ;;  %v2535_v31 = vmax.f32 %v2519_v63, 0.0 }
 0x163   : > { %v2235_v34 = vpop.f32.mrf.mxu3  ;;  %v1678_v55 = vpop.f32.mrf.mxu1 }
 0x164   : > { %v2274_v47 = vadd.f32 %v2235_v34, %v1920_v40  ;;  %v1715_v1 = vadd.f32 %v1678_v55, %v4484_v42 }
 0x166   : > { %v2500_v16 = vadd.f32 %v2461_v3, %v2274_v47 }
 0x168   : > { %v2520_v50 = vadd.f32 %v4673_v38, %v2500_v16 }
 0x169   : > { %v2464_v33 = vpop.f32.mrf.mxu0  ;;  %v1884_v35 = vpop.f32.mrf.mxu2 }
 0x16a   : > { %v2536_v48 = vmax.f32 %v2520_v50, 0.0  ;;  %v1921_v9 = vadd.f32 %v1884_v35, %v1715_v1 }
 0x16b   : > { %v2238_v15 = vpop.f32.mrf.mxu3  ;;  %v1680_v14 = vpop.f32.mrf.mxu1 }
 0x16c   : > { %v3394_v61 = vpack.c.bf16 %v2536_v48, %v2535_v31  ;;  %v2275_v10 = vadd.f32 %v2238_v15, %v1921_v9  ;;  %v1716_v4 = vadd.f32 %v1680_v14, %v4501_v59 }
 0x16e   : > { %3395 = vst [vmem:[%s4681_s24] sm:$0xff] %v3394_v61   ;;  %v2501_v51 = vadd.f32 %v2464_v33, %v2275_v10 }
 0x170   : > { %v2521_v23 = vadd.f32 %v4673_v38, %v2501_v51 }
 0x171   : > { %v2466_v8 = vpop.f32.mrf.mxu0  ;;  %v1886_v12 = vpop.f32.mrf.mxu2 }
 0x172   : > { %v1922_v22 = vadd.f32 %v1886_v12, %v1716_v4  ;;  %v2537_v52 = vmax.f32 %v2521_v23, 0.0 }
 0x173   : > { %v2240_v42 = vpop.f32.mrf.mxu3  ;;  %v1683_v11 = vpop.f32.mrf.mxu1 }
 0x174   : > { %v2276_v5 = vadd.f32 %v2240_v42, %v1922_v22  ;;  %v1717_v17 = vadd.f32 %v1683_v11, %v4520_v37 }
 0x176   : > { %v2502_v58 = vadd.f32 %v2466_v8, %v2276_v5 }
 0x178   : > { %v2522_v45 = vadd.f32 %v4673_v38, %v2502_v58 }
 0x179   : > { %v2469_v32 = vpop.f32.mrf.mxu0  ;;  %v1889_v43 = vpop.f32.mrf.mxu2 }
 0x17a   : > { %v2538_v44 = vmax.f32 %v2522_v45, 0.0  ;;  %v1923_v59 = vadd.f32 %v1889_v43, %v1717_v17 }
 0x17b   : > { %v2243_v7 = vpop.f32.mrf.mxu3  ;;  %v1685_v26 = vpop.f32.mrf.mxu1 }
 0x17c   : > { %v3399_v19 = vpack.c.bf16 %v2538_v44, %v2537_v52  ;;  %v2277_v2 = vadd.f32 %v2243_v7, %v1923_v59  ;;  %v1718_v60 = vadd.f32 %v1685_v26, %v4532_v54 }
 0x17e   : > { %3431 = vst [vmem:[%s4681_s24 + $0x8] sm:$0xff] %v3399_v19   ;;  %v2503_v49 = vadd.f32 %v2469_v32, %v2277_v2 }
 0x180   : > { %v2523_v36 = vadd.f32 %v4673_v38, %v2503_v49 }
 0x181   : > { %v2471_v28 = vpop.f32.mrf.mxu0  ;;  %v1891_v20 = vpop.f32.mrf.mxu2 }
 0x182   : > { %v1924_v25 = vadd.f32 %v1891_v20, %v1718_v60  ;;  %v2539_v40 = vmax.f32 %v2523_v36, 0.0 }
 0x183   : > { %v2245_v46 = vpop.f32.mrf.mxu3  ;;  %v1688_v56 = vpop.f32.mrf.mxu1 }
 0x184   : > { %v2278_v37 = vadd.f32 %v2245_v46, %v1924_v25  ;;  %v1719_v3 = vadd.f32 %v1688_v56, %v4558_v6 }
 0x186   : > { %v2504_v21 = vadd.f32 %v2471_v28, %v2278_v37 }
 0x188   : > { %v2524_v27 = vadd.f32 %v4673_v38, %v2504_v21 }
 0x189   : > { %v2474_v18 = vpop.f32.mrf.mxu0  ;;  %v1894_v24 = vpop.f32.mrf.mxu2 }
 0x18a   : > { %v2540_v34 = vmax.f32 %v2524_v27, 0.0  ;;  %v1925_v54 = vadd.f32 %v1894_v24, %v1719_v3 }
 0x18b   : > { %v2248_v55 = vpop.f32.mrf.mxu3  ;;  %v1690_v47 = vpop.f32.mrf.mxu1 }
 0x18c   : > { %v3404_v63 = vpack.c.bf16 %v2540_v34, %v2539_v40  ;;  %v2279_v16 = vadd.f32 %v2248_v55, %v1925_v54  ;;  %v1720_v50 = vadd.f32 %v1690_v47, %v4574_v41 }
 0x18e   : > { %3432 = vst [vmem:[%s4681_s24 + $0x10] sm:$0xff] %v3404_v63   ;;  %v2505_v35 = vadd.f32 %v2474_v18, %v2279_v16 }
 0x190   : > { %v2525_v15 = vadd.f32 %v4673_v38, %v2505_v35 }
 0x191   : > { %v2476_v1 = vpop.f32.mrf.mxu0  ;;  %v1896_v33 = vpop.f32.mrf.mxu2 }
 0x192   : > { %v1926_v31 = vadd.f32 %v1896_v33, %v1720_v50  ;;  %v2541_v12 = vmax.f32 %v2525_v15, 0.0 }
 0x193   : > { %v2250_v48 = vpop.f32.mrf.mxu3  ;;  %v1693_v9 = vpop.f32.mrf.mxu1 }
 0x194   : > { %v2280_v6 = vadd.f32 %v2250_v48, %v1926_v31  ;;  %v1721_v10 = vadd.f32 %v1693_v9, %v4593_v57 }
 0x196   : > { %v2506_v14 = vadd.f32 %v2476_v1, %v2280_v6 }
 0x198   : > { %v2526_v61 = vadd.f32 %v4673_v38, %v2506_v14 }
 0x199   : > { %v2479_v4 = vpop.f32.mrf.mxu0  ;;  %v1899_v8 = vpop.f32.mrf.mxu2 }
 0x19a   : > { %v2542_v51 = vmax.f32 %v2526_v61, 0.0  ;;  %v1927_v41 = vadd.f32 %v1899_v8, %v1721_v10 }
 0x19b   : > { %v2253_v22 = vpop.f32.mrf.mxu3  ;;  %v1695_v42 = vpop.f32.mrf.mxu1 }
 0x19c   : > { %v3409_v11 = vpack.c.bf16 %v2542_v51, %v2541_v12  ;;  %v2281_v5 = vadd.f32 %v2253_v22, %v1927_v41  ;;  %v1722_v23 = vadd.f32 %v1695_v42, %v4605_v0 }
 0x19e   : > { %3433 = vst [vmem:[%s4681_s24 + $0x18] sm:$0xff] %v3409_v11   ;;  %v2507_v17 = vadd.f32 %v2479_v4, %v2281_v5 }
 0x1a0   : > { %v2527_v44 = vadd.f32 %v4673_v38, %v2507_v17 }
 0x1a1   : > { %v2481_v58 = vpop.f32.mrf.mxu0  ;;  %v1901_v45 = vpop.f32.mrf.mxu2 }
 0x1a2   : > { %v1928_v32 = vadd.f32 %v1901_v45, %v1722_v23  ;;  %v2543_v60 = vmax.f32 %v2527_v44, 0.0 }
 0x1a3   : > { %v2255_v43 = vpop.f32.mrf.mxu3  ;;  %v1698_v52 = vpop.f32.mrf.mxu1 }
 0x1a4   : > { %v2282_v57 = vadd.f32 %v2255_v43, %v1928_v32  ;;  %v1723_v26 = vadd.f32 %v1698_v52, %v4631_v62 }
 0x1a6   : > { %v2508_v59 = vadd.f32 %v2481_v58, %v2282_v57 }
 0x1a8   : > { %v2528_v7 = vadd.f32 %v4673_v38, %v2508_v59 }
 0x1a9   : > { %v2484_v19 = vpop.f32.mrf.mxu0  ;;  %v1904_v2 = vpop.f32.mrf.mxu2 }
 0x1aa   : > { %v2544_v28 = vmax.f32 %v2528_v7, 0.0  ;;  %v1929_v0 = vadd.f32 %v1904_v2, %v1723_v26 }
 0x1ab   : > { %v2258_v20 = vpop.f32.mrf.mxu3  ;;  %v1700_v49 = vpop.f32.mrf.mxu1 }
 0x1ac   : > { %v3414_v25 = vpack.c.bf16 %v2544_v28, %v2543_v60  ;;  %v2283_v46 = vadd.f32 %v2258_v20, %v1929_v0  ;;  %v1724_v56 = vadd.f32 %v1700_v49, %v4638_v13 }
 0x1ae   : > { %3434 = vst [vmem:[%s4681_s24 + $0x20] sm:$0xff] %v3414_v25   ;;  %v2509_v21 = vadd.f32 %v2484_v19, %v2283_v46 }
 0x1b0   : > { %v2529_v24 = vadd.f32 %v4673_v38, %v2509_v21 }
 0x1b1   : > { %v2486_v37 = vpop.f32.mrf.mxu0  ;;  %v1906_v36 = vpop.f32.mrf.mxu2 }
 0x1b2   : > { %v1930_v27 = vadd.f32 %v1906_v36, %v1724_v56  ;;  %v2545_v63 = vmax.f32 %v2529_v24, 0.0 }
 0x1b3   : > { %v2260_v3 = vpop.f32.mrf.mxu3  ;;  %v1703_v18 = vpop.f32.mrf.mxu1 }
 0x1b4   : > { %v2284_v62 = vadd.f32 %v2260_v3, %v1930_v27  ;;  %v1725_v54 = vadd.f32 %v1703_v18, %v4652_v53 }
 0x1b6   : > { %v2510_v40 = vadd.f32 %v2486_v37, %v2284_v62 }
 0x1b8   : > { %v2530_v34 = vadd.f32 %v4673_v38, %v2510_v40 }
 0x1b9   : > { %v2489_v55 = vpop.f32.mrf.mxu0  ;;  %v1909_v47 = vpop.f32.mrf.mxu2 }
 0x1ba   : > { %v2546_v16 = vmax.f32 %v2530_v34, 0.0  ;;  %v1931_v13 = vadd.f32 %v1909_v47, %v1725_v54 }
 0x1bb   : > { %v2263_v50 = vpop.f32.mrf.mxu3  ;;  %v1705_v1 = vpop.f32.mrf.mxu1 }
 0x1bc   : > { %v3419_v33 = vpack.c.bf16 %v2546_v16, %v2545_v63  ;;  %v2285_v35 = vadd.f32 %v2263_v50, %v1931_v13  ;;  %v1726_v31 = vadd.f32 %v1705_v1, %v4660_v29 }
 0x1be   : > { %3435 = vst [vmem:[%s4681_s24 + $0x28] sm:$0xff] %v3419_v33   ;;  %v2511_v6 = vadd.f32 %v2489_v55, %v2285_v35 }
 0x1c0   : > { %v2531_v10 = vadd.f32 %v4673_v38, %v2511_v6 }
 0x1c1   : > { %v2491_v48 = vpop.f32.mrf.mxu0  ;;  %v1911_v9 = vpop.f32.mrf.mxu2 }
 0x1c2   : > { %v1932_v15 = vadd.f32 %v1911_v9, %v1726_v31  ;;  %v2547_v41 = vmax.f32 %v2531_v10, 0.0 }
 0x1c3   : > { %v2265_v14 = vpop.f32.mrf.mxu3  ;;  %v1708_v53 = vpop.f32.mrf.mxu1 }
 0x1c4   : > { %v2286_v61 = vadd.f32 %v2265_v14, %v1932_v15  ;;  %v1727_v12 = vadd.f32 %v1708_v53, %v4663_v39 }
 0x1c6   : > { %v2512_v4 = vadd.f32 %v2491_v48, %v2286_v61 }
 0x1c8   : > { %v2532_v8 = vadd.f32 %v4673_v38, %v2512_v4 }
 0x1c9   : > { %v1914_v51 = vpop.f32.mrf.mxu2  ;;  %v2494_v11 = vpop.f32.mrf.mxu0 }
 0x1ca   : > { %v2548_v29 = vmax.f32 %v2532_v8, 0.0  ;;  %v1933_v22 = vadd.f32 %v1914_v51, %v1727_v12 }
 0x1cb   : > { %v2268_v42 = vpop.f32.mrf.mxu3  ;;  %v1710_v23 = vpop.f32.mrf.mxu1 }
 0x1cc   : > { %v3424_v5 = vpack.c.bf16 %v2548_v29, %v2547_v41  ;;  %v2287_v58 = vadd.f32 %v2268_v42, %v1933_v22  ;;  %v1728_v45 = vadd.f32 %v1710_v23, %v4666_v30 }
 0x1ce   : > { %3436 = vst [vmem:[%s4681_s24 + $0x30] sm:$0xff] %v3424_v5   ;;  %v2513_v32 = vadd.f32 %v2494_v11, %v2287_v58 }
 0x1d0   : > { %v2533_v44 = vadd.f32 %v4673_v38, %v2513_v32 }
 0x1d1   : > { %v1916_v17 = vpop.f32.mrf.mxu2  ;;  %v2496_v57 = vpop.f32.mrf.mxu0 }
 0x1d2   : > { %v1934_v43 = vadd.f32 %v1916_v17, %v1728_v45  ;;  %v2549_v7 = vmax.f32 %v2533_v44, 0.0 }
 0x1d3   : > { %v2270_v39 = vpop.f32.mrf.mxu3 }
 0x1d4   : > { %v2288_v52 = vadd.f32 %v2270_v39, %v1934_v43 }
 0x1d6   : > { %v2514_v59 = vadd.f32 %v2496_v57, %v2288_v52 }
 0x1d8   : > { %v2534_v30 = vadd.f32 %v4673_v38, %v2514_v59 }
 0x1da   : > { %v2550_v26 = vmax.f32 %v2534_v30, 0.0 }
 0x1dc   : > { %v3429_v19 = vpack.c.bf16 %v2550_v26, %v2549_v7 }
 0x1de   : > { %3437 = vst [vmem:[%s4681_s24 + $0x38] sm:$0xff] %v3429_v19  }
 0x1df   : > { %3567 = shalt.err (!%p3564_p6)
}
 0x1e0   : > { %s3636_s20 = smov 64   ;;  %s3637_s24 = smov 4  }
 0x1e1   : > { %3463 = dma.vmem_to_hbm [thread:$0]  (%p3709_p3), %s2600_s7, 1024, %s2602_s8, %s2584_s9, %s3636_s20, %s3636_s20, %s3637_s24  }
 0x1e2 PF: > { %p3469_p7 = scmp.ge.s32.totalorder %s3634_s19, 2  ;;  %s2616_s5 = sand.u32 1, %s3606_s12  }
 0x1e3   : > { %s2617_s15 = scalar_lea.sflag [#allocation3], %s2616_s5 }
 0x1e4   : > { %p3466_p9 = pnand %p3469_p7, %p3718_p8 }
 0x1e6   : > { %p3467_p10 = pneg %p3466_p9 }
 0x1e8   : > { %3601 = dma.done.wait (%p3467_p10), %s2617_s15, 1024  }
 0x1e9   : > { %3603 = vsyncadd (%p3467_p10), %s2617_s15, 4294966272  ;;  %s16_s19 = sadd.s32 1, %s3634_s19   ;;  %s4785_s12 = smov %s3610_s13 }
 0x1ea   : > { %p13_p11 = scmp.ge.s32.totalorder %s16_s19, 6   ;;  %s4786_s13 = smov %s3614_s14 }
 0x1eb   : > { %s4787_s14 = smov %s3727_s30  ;;  %s4788_s15 = smov %s3626_s17 }
 0x1ec   : > { %s4789_s16 = smov %s3630_s18  ;;  %s4790_s17 = smov %s4793_s22 }
 0x1ed   : > { %s4791_s18 = smov %s4797_s23  ;;  %15 = sbr.rel (!%p13_p11) target bundleno = 5 (0x5), region = 78 }
 0x1f2   :  { %2623 = vsyncpa [#allocation3], 1 }
 0x1f3   :  { %2625 = vsyncpa [#allocation3 + $0x1], 1 }

</bundles_post_ra>
